<compile_context>
chip_gen: v7x
topology: tpu7x:2x2x1
jax: 0.10.0
libtpu: 0.0.40
codegen_flags: <defaults>
</compile_context>

<pallas_src>
import jax
import jax.numpy as jnp
from jax.experimental import pallas as pl
from jax.experimental.pallas import tpu as pltpu

# VideoTransform constants (grayscale weights in BGR order, mean/std normalize).
GRAY_W_B, GRAY_W_G, GRAY_W_R = 0.114, 0.587, 0.299
NORM_MEAN, NORM_STD = 0.421, 0.165

# Fold  gray/255 -> (x - mean)/std  into a single affine:
#   gray_norm = wB'*B + wG'*G + wR'*R + bias
_SCALE = 1.0 / (255.0 * NORM_STD)
GRAY_B_FOLD = GRAY_W_B * _SCALE
GRAY_G_FOLD = GRAY_W_G * _SCALE
GRAY_R_FOLD = GRAY_W_R * _SCALE
NORM_BIAS_FOLD = -NORM_MEAN / NORM_STD


# ----------------------------------------------------------------------------
# One-time model-load folding (NOT per-chunk): flip + grayscale + normalize
# are absorbed into the projection weights and a per-column bias.
# ----------------------------------------------------------------------------
def prepare_vsr_weights(w_proj, H, W):
    """w_proj: (H*W, D) f32 -> (w_fold (3*H*W, D) bf16, bias (1, D) f32).

    feats[t, d] = sum_{p,c} frame_u8[t, p, c] * w_fold[p*3+c, d] + bias[d]
    reproduces: flip(W) -> BGR grayscale -> /255 -> (x-mean)/std -> @ w_proj.
    """
    HW, D = w_proj.shape
    assert HW == H * W
    # cv2.flip(..., 1) flips along W; fold that column permutation into rows.
    w_flip = w_proj.reshape(H, W, D)[:, ::-1, :].reshape(HW, D)
    # Grayscale + /255 + /std folded into per-channel scaling of the rows.
    gray_w = jnp.array([GRAY_B_FOLD, GRAY_G_FOLD, GRAY_R_FOLD], w_proj.dtype)  # BGR
    w_fold = (w_flip[:, None, :] * gray_w[None, :, None]).reshape(HW * 3, D)
    # -mean/std per pixel -> per-output-column bias (flip-invariant sum).
    bias = (NORM_BIAS_FOLD * jnp.sum(w_flip, axis=0, keepdims=True)).astype(jnp.float32)
    return w_fold.astype(jnp.bfloat16), bias


# ----------------------------------------------------------------------------
# Fused kernel: uint8 frames -> bf16 -> MXU projection (+ folded-normalize bias)
# ----------------------------------------------------------------------------
def vsr_frontend_kernel(frames_ref, w_ref, bias_ref, o_ref):
    # frames_ref: (tm, 3K) uint8, cv2-native interleaved BGR pixels
    # w_ref:      (3K, D)  bf16 folded projection weights (VMEM-resident)
    # bias_ref:   (1, D)   f32 folded normalization bias
    # o_ref:      (tm, D)  f32 features
    # uint8 values 0..255 are exact in bf16; cast BEFORE any arithmetic.
    x = frames_ref[...].astype(jnp.float32).astype(jnp.bfloat16)
    o_ref[...] = (jnp.dot(x, w_ref[...], preferred_element_type=jnp.float32)
                  + bias_ref[...])


def vsr_frontend(frames_u8, w_fold_bf16, bias, *, tm=128, vmem_limit_bytes=None):
    """frames_u8: (T, H, W, 3) uint8 BGR; w_fold_bf16: (3*H*W, D); bias: (1, D).

    Returns (T, D) f32 features. tm: frames per grid step. Use tm=64 for short
    chunks on dual-TC v7x (>=2 steps/core); 256-512 for long clips on v5e/v6e
    (raise vmem_limit_bytes past the scoped default if needed).
    """
    T, H, W, C = frames_u8.shape
    K3, D = w_fold_bf16.shape
    assert C == 3 and K3 == 3 * H * W
    assert bias.shape == (1, D)
    assert T % tm == 0
    # uint8 sublane tile is (32, 128); lane dims must be 128-multiples.
    assert tm % 32 == 0 and K3 % 128 == 0 and D % 128 == 0
    # Whole weight stays resident: 3K*D bf16 must be small (it is: ~1.5 MiB here).
    assert K3 * D * 2 <= 8 * 1024 * 1024

    # Free, contiguous flatten — no transpose, no extra HBM pass.
    x = frames_u8.reshape(T, K3)

    return pl.pallas_call(
        vsr_frontend_kernel,
        out_shape=jax.ShapeDtypeStruct((T, D), jnp.float32),
        grid_spec=pltpu.PrefetchScalarGridSpec(
            num_scalar_prefetch=0,
            grid=(T // tm,),
            in_specs=[
                pl.BlockSpec((tm, K3), lambda i: (i, 0)),   # uint8 frame rows
                pl.BlockSpec((K3, D), lambda i: (0, 0)),    # weights, resident
                pl.BlockSpec((1, D), lambda i: (0, 0)),     # bias, resident
            ],
            out_specs=pl.BlockSpec((tm, D), lambda i: (i, 0)),
        ),
        compiler_params=pltpu.CompilerParams(
            dimension_semantics=("parallel",),
            vmem_limit_bytes=vmem_limit_bytes),
    )(x, w_fold_bf16, bias)


if __name__ == "__main__":
    key = jax.random.PRNGKey(0)
    k_frames, k_w = jax.random.split(key)

    # One inference chunk: T frames of a H x W mouth ROI, BGR uint8 (cv2-native).
    T, H, W, C = 256, 32, 32, 3
    D = 256                      # feature width of the stand-in frontend
    HW = H * W

    frames_u8 = jax.random.randint(k_frames, (T, H, W, C), 0, 256,
                                   dtype=jnp.int32).astype(jnp.uint8)
    w_proj = jax.random.normal(k_w, (HW, D), jnp.float32) * 0.02

    # --- one-time model-load folding (flip + grayscale + normalize + bf16) ---
    w_fold, bias = prepare_vsr_weights(w_proj, H, W)
    w_fold, bias = jax.block_until_ready((w_fold, bias))

    # --- per-chunk inference: one fused Pallas kernel -------------------------
    # tm=64 -> 4 grid steps for this 256-frame chunk (>=2 pipelined steps per
    # TensorCore on v7x); raise tm for long clips on single-TC v5e/v6e.
    feats = vsr_frontend(frames_u8, w_fold, bias, tm=64)
    feats = jax.block_until_ready(feats)

    # --- reference: module semantics in plain JAX ----------------------------
    frames_f32 = frames_u8.astype(jnp.float32)
    flipped = frames_f32[:, :, ::-1, :]
    gray_ref = ((GRAY_W_B * flipped[..., 0]
                 + GRAY_W_G * flipped[..., 1]
                 + GRAY_W_R * flipped[..., 2]) / 255.0 - NORM_MEAN) / NORM_STD
    feats_ref = jnp.dot(gray_ref.reshape(T, HW), w_proj,
                        precision=jax.lax.Precision.HIGHEST)
    # bf16 MXU weights (f32 accumulate) -> relaxed tolerance vs f32 reference.
    max_err = float(jnp.max(jnp.abs(feats - feats_ref)))
    assert jnp.allclose(feats, feats_ref, atol=5e-2, rtol=5e-2), max_err

    print("KERNEL_OK")
</pallas_src>

<mosaic_0001>
module attributes {stable_mosaic.version = 11 : i64} {
  func.func @vsr_frontend_kernel(%arg0: i32, %arg1: memref<64x3072xi8, #tpu.memory_space<vmem>>, %arg2: memref<3072x256xbf16, #tpu.memory_space<vmem>>, %arg3: memref<1x256xf32, #tpu.memory_space<vmem>>, %arg4: memref<64x256xf32, #tpu.memory_space<vmem>>) attributes {dimension_semantics = [#tpu.dimension_semantics<parallel>], iteration_bounds = array<i64: 4>, scalar_prefetch = 0 : i64, scratch_operands = 0 : i64, tpu.core_type = #tpu.core_type<tc>, window_params = [{transform_indices = @transform_0, window_bounds = array<i64: 64, 3072>}, {pipeline_mode = #tpu.pipeline_mode<synchronous>, transform_indices = @transform_1, window_bounds = array<i64: 3072, 256>}, {pipeline_mode = #tpu.pipeline_mode<synchronous>, transform_indices = @transform_2, window_bounds = array<i64: 1, 256>}, {transform_indices = @transform_3, window_bounds = array<i64: 64, 256>}]} {
    %c0 = arith.constant 0 : index
    %c0_0 = arith.constant 0 : index
    %0 = vector.load %arg1[%c0, %c0_0] : memref<64x3072xi8, #tpu.memory_space<vmem>>, vector<64x3072xi8>
    %1 = arith.uitofp %0 : vector<64x3072xi8> to vector<64x3072xf32>
    %2 = arith.truncf %1 : vector<64x3072xf32> to vector<64x3072xbf16>
    %c0_1 = arith.constant 0 : index
    %c0_2 = arith.constant 0 : index
    %3 = vector.load %arg2[%c0_1, %c0_2] : memref<3072x256xbf16, #tpu.memory_space<vmem>>, vector<3072x256xbf16>
    %cst = arith.constant dense<0.000000e+00> : vector<64x256xf32>
    %4 = tpu.matmul %2, %3, %cst {dimension_numbers = #tpu.dot_dimension_numbers<[1], [0], [0], [1], [0, 0, 1, 1], [], []>} : vector<64x3072xbf16>, vector<3072x256xbf16>, vector<64x256xf32> -> vector<64x256xf32>
    %c0_3 = arith.constant 0 : index
    %c0_4 = arith.constant 0 : index
    %5 = vector.load %arg3[%c0_3, %c0_4] : memref<1x256xf32, #tpu.memory_space<vmem>>, vector<1x256xf32>
    %6 = vector.broadcast %5 : vector<1x256xf32> to vector<64x256xf32>
    %7 = arith.addf %4, %6 : vector<64x256xf32>
    %c0_5 = arith.constant 0 : index
    %c0_6 = arith.constant 0 : index
    %8 = vector.load %arg4[%c0_5, %c0_6] : memref<64x256xf32, #tpu.memory_space<vmem>>, vector<64x256xf32>
    tpu.vector_store %arg4[%c0_5, %c0_6], %7 {strides = array<i32>} : memref<64x256xf32, #tpu.memory_space<vmem>>, vector<64x256xf32>,
    return
  }
  func.func @transform_0(%arg0: i32) -> (i32, i32) {
    %c0_i32 = arith.constant 0 : i32
    %c0_i32_0 = arith.constant 0 : i32
    return %arg0, %c0_i32 : i32, i32
  }
  func.func @transform_1(%arg0: i32) -> (i32, i32) {
    %c0_i32 = arith.constant 0 : i32
    %c0_i32_0 = arith.constant 0 : i32
    %c0_i32_1 = arith.constant 0 : i32
    return %c0_i32, %c0_i32_0 : i32, i32
  }
  func.func @transform_2(%arg0: i32) -> (i32, i32) {
    %c0_i32 = arith.constant 0 : i32
    %c0_i32_0 = arith.constant 0 : i32
    %c0_i32_1 = arith.constant 0 : i32
    return %c0_i32, %c0_i32_0 : i32, i32
  }
  func.func @transform_3(%arg0: i32) -> (i32, i32) {
    %c0_i32 = arith.constant 0 : i32
    %c0_i32_0 = arith.constant 0 : i32
    return %arg0, %c0_i32 : i32, i32
  }
}

</mosaic_0001>

<bundles_post_ra>
// kernel: tpu_custom_call.1
= control target key start
LH: loop header
LB: loop body
LE: loop exit
PB: predicated region body
PF: predicated region fallthrough
CT: control target
= control target key end

     0   :  { %8 = vsyncpa [#allocation3], 0  ;;  %s5477_s0 = inlined_call_operand.hbm [shape: u8[256,3072], index: 0, kind: input, shape index: {}]   ;;  %s5478_s1 = inlined_call_operand.hbm [shape: bf16[3072,256], index: 1, kind: input, shape index: {}]   ;;  %s5479_s2 = inlined_call_operand.hbm [shape: f32[1,256], index: 2, kind: input, shape index: {}]   ;;  %s5480_s3 = inlined_call_operand.hbm [shape: f32[256,256], index: 3, kind: output, shape index: {}]  }
   0x1   :  { %10 = vsyncpa [#allocation3 + $0x1], 0 }
   0x2   :  { %11 = vsyncpa [#allocation6], 0 }
   0x3   :  { %12 = vsyncpa [#allocation4], 0 }
   0x4   :  { %14 = vsyncpa [#allocation4 + $0x1], 0  ;;  %s5114_s12 = smov 0   ;;  %s5116_s13 = smov 0  }
   0x5   :  { %s5118_s14 = smov 0   ;;  %s5120_s15 = smov 0  }
   0x6 LB: > { %s5135_s16 = sadd.s32 4294967295, %s5082_s15   ;;  %s3678_s17 = sadd.s32 4294967294, %s5082_s15   ;;  %s5082_s15 = sphi %s5120_s15, %s5499_s15   ;;  %s5078_s14 = sphi %s5118_s14, %s5498_s14   ;;  %s5074_s13 = sphi %s5116_s13, %s5497_s13   ;;  %s5070_s12 = sphi %s5114_s12, %s5496_s12  }
   0x7   : > { %p40_p0 = scmp.ne.s32.totalorder %s5074_s13, %s5070_s12  ;;  %p5481_p1 = scmp.eq.s32.totalorder %s5135_s16, 0 }
   0x8   : > { %p112_p3 = scmp.eq.s32.totalorder %s3678_s17, 3  ;;  %p3679_p5 = scmp.ge.s32.totalorder %s5082_s15, 1 }
   0x9   : > { %p5144_p4 = por %p5481_p1, %p40_p0  ;;  %p119_p7 = scmp.lt.s32.totalorder %s5082_s15, 5 }
   0xa   : > { %p5149_p6 = por %p112_p3, %p40_p0  ;;  %s5084_s21 = smov [#allocation5]  }
   0xb   : > { %s5484_s18 = scalar_select %p5144_p4, 1, 0 }
   0xc   : > { %s5485_s19 = scalar_select %p5149_p6, 1, 0 }
   0xd   : > { %p5154_p8 = pnand %p3679_p5, %p119_p7  ;;  %s131_s22 = sshll.u32 %s5084_s21, 4  ;;  %s132_s22 = int_to_ptr.vmem [resolvable:$true] %s131_s22 }
   0xe   : > { %s5085_s24 = smov [#allocation7]   ;;  %s4926_s28 = scalar_lea.hbm %s5478_s1, 49152 }
   0xf   : > { %s5486_s20 = scalar_select %p5154_p8, 1, 0 }
  0x10   : > { %p4289_p9 = pneg %p5154_p8  ;;  %s145_s25 = sshll.u32 %s5085_s24, 4  ;;  %s5166_s25 = int_to_ptr.vmem [resolvable:$true] %s145_s25 }
  0x11   : > { %p4927_p11 = scmp.ne.s32.totalorder %s5478_s1, %s4926_s28  ;;  %p4933_p3 = scmp.lt.u32.totalorder %s4926_s28, %s5478_s1 }
  0x12   : > { %p5162_p10 = pnand %p4289_p9, %p5481_p1 }
  0x14   : > { %p4928_p12 = pneg %p5162_p10 }
  0x16   : > { %p4929_p13 = pnand %p4928_p12, %p4927_p11 }
  0x18   : > { %p4930_p0 = pneg %p4929_p13 }
  0x1a   : > { %p4935_p5 = pnand %p4933_p3, %p4930_p0 }
  0x1c   : > { %4938 = shalt.err (!%p4935_p5)
}
  0x1d   : > { %s4939_s6 = scalar_lea.vmem %s132_s22, 49152  ;;  %p4947_p2 = scmp.lt.s32.totalorder %s132_s22, %s132_s22 }
  0x1e   : > { %p4940_p7 = scmp.ne.s32.totalorder %s132_s22, %s4939_s6  ;;  %p4948_p6 = scmp.lt.s32.totalorder %s4939_s6, %s4939_s6 }
  0x20   : > { %p4942_p9 = pnand %p4940_p7, %p4928_p12  ;;  %p4949_p4 = por %p4948_p6, %p4947_p2 }
  0x22   : > { %p4943_p1 = pneg %p4942_p9 }
  0x24   : > { %p4950_p8 = pnand %p4949_p4, %p4943_p1 }
  0x26   : > { %4953 = shalt.err (!%p4950_p8)
}
  0x27   : > { %s5086_s7 = smov 128   ;;  %s5087_s8 = smov 8  }
  0x28   : > { %4292 = dma.hbm_to_vmem [thread:$0]  (!%p5162_p10), %s5478_s1, 49152, %s132_s22, [#allocation6], %s5086_s7, %s5086_s7, %s5087_s8  }
  0x29   : > { %s4954_s21 = scalar_lea.hbm %s5479_s2, 32 }
  0x2a   : > { %p4955_p11 = scmp.ne.s32.totalorder %s5479_s2, %s4954_s21  ;;  %p4961_p4 = scmp.lt.u32.totalorder %s4954_s21, %s5479_s2 }
  0x2c   : > { %p4957_p1 = pnand %p4955_p11, %p4928_p12 }
  0x2e   : > { %p4958_p2 = pneg %p4957_p1 }
  0x30   : > { %p4963_p6 = pnand %p4961_p4, %p4958_p2 }
  0x32   : > { %4966 = shalt.err (!%p4963_p6)
}
  0x33   : > { %s4967_s22 = scalar_lea.vmem %s5166_s25, 32  ;;  %p4975_p3 = scmp.lt.s32.totalorder %s5166_s25, %s5166_s25 }
  0x34   : > { %p4968_p8 = scmp.ne.s32.totalorder %s5166_s25, %s4967_s22  ;;  %p4976_p5 = scmp.lt.s32.totalorder %s4967_s22, %s4967_s22 }
  0x36   : > { %p4970_p13 = pnand %p4968_p8, %p4928_p12  ;;  %p4977_p7 = por %p4976_p5, %p4975_p3 }
  0x38   : > { %p4971_p0 = pneg %p4970_p13 }
  0x3a   : > { %p4978_p9 = pnand %p4977_p7, %p4971_p0 }
  0x3c   : > { %4981 = shalt.err (!%p4978_p9)
}
  0x3d   : > { %4295 = dma.hbm_to_vmem [thread:$0]  (!%p5162_p10), %s5479_s2, 32, %s5166_s25, [#allocation6]  }
  0x3e   : > { %s5216_s4 = sadd.s32 1, %s5082_s15   ;;  %s27_s23 = sadd.s32 1, %s5078_s14 }
  0x3f   : > { %s24_s5 = ssub.s32 %s5082_s15, %s5216_s4  ;;  %p34_p12 = scmp.ne.s32.totalorder %s5078_s14, %s5074_s13 }
  0x40   : > { %p25_p11 = scmp.eq.s32.totalorder %s24_s5, 0  ;;  %p35_p1 = scmp.eq.s32.totalorder %s5082_s15, 0 }
  0x41   : > { %p5488_p2 = scmp.eq.s32.totalorder %s5135_s16, 3  ;;  %p4306_p6 = scmp.lt.s32.totalorder %s5082_s15, 4 }
  0x42   : > { %s5232_s7 = scalar_select %p25_p11, %s5078_s14, %s27_s23  }
  0x43   : > { %p5226_p4 = por %p5488_p2, %p34_p12  ;;  %p36_p8 = por %p35_p1, %p34_p12 }
  0x44   : > { %s156_s8 = sand.u32 1, %s5078_s14   ;;  %s4275_s25 = smul.u32 6144, %s5082_s15 }
  0x45   : > { %s4274_s9 = smul.u32 384, %s156_s8  ;;  %p5236_p10 = pnand %p4306_p6, %p36_p8 }
  0x46   : > { %s5243_s21 = scalar_lea.hbm %s5477_s0, %s4275_s25  ;;  %s5247_s27 = scalar_lea.sflag [#allocation3], %s156_s8 }
  0x47   : > { %s160_s24 = scalar_lea.vmem [#allocation2], %s4274_s9  ;;  %s4982_s28 = scalar_lea.hbm %s5243_s21, 6144 }
  0x48   : > { %s168_s26 = sshll.u32 %s160_s24, 4  ;;  %p4983_p13 = scmp.ne.s32.totalorder %s5243_s21, %s4982_s28  ;;  %s5245_s26 = int_to_ptr.vmem [resolvable:$true] %s168_s26 }
  0x49   : > { %p4984_p0 = pneg %p5236_p10  ;;  %s4987_s30 = scalar_lea.hbm %s5477_s0, 24576 }
  0x4a   : > { %p4988_p7 = scmp.lt.u32.totalorder %s5243_s21, %s5477_s0  ;;  %p4989_p9 = scmp.lt.u32.totalorder %s4987_s30, %s4982_s28 }
  0x4b   : > { %p4985_p3 = pnand %p4984_p0, %p4983_p13  ;;  %p4991_p11 = scmp.lt.u32.totalorder %s4982_s28, %s5243_s21 }
  0x4c   : > { %p4990_p12 = por %p4989_p9, %p4988_p7 }
  0x4d   : > { %p4986_p5 = pneg %p4985_p3 }
  0x4e   : > { %p4992_p1 = por %p4991_p11, %p4990_p12 }
  0x50   : > { %p4993_p2 = pnand %p4992_p1, %p4986_p5 }
  0x52   : > { %4996 = shalt.err (!%p4993_p2)
}
  0x53   : > { %s4997_s8 = scalar_lea.vmem %s5245_s26, 6144  ;;  %s5088_s9 = smov [#allocation2]  }
  0x54   : > { %p4998_p6 = scmp.ne.s32.totalorder %s5245_s26, %s4997_s8  ;;  %s5002_s25 = sshll.u32 %s5088_s9, 4  ;;  %s5003_s25 = int_to_ptr.vmem [resolvable:$false] %s5002_s25 }
  0x55   : > { %s5004_s11 = scalar_lea.vmem %s5003_s25, 12288  ;;  %p5005_p3 = scmp.lt.s32.totalorder %s5245_s26, %s5003_s25 }
  0x56   : > { %p5000_p8 = pnand %p4998_p6, %p4984_p0  ;;  %p5006_p7 = scmp.lt.s32.totalorder %s5004_s11, %s4997_s8 }
  0x58   : > { %p5001_p13 = pneg %p5000_p8  ;;  %p5007_p9 = por %p5006_p7, %p5005_p3 }
  0x5a   : > { %p5008_p12 = pnand %p5007_p9, %p5001_p13 }
  0x5c   : > { %5011 = shalt.err (!%p5008_p12)
}
  0x5d   : > { %s5089_s17 = smov 3072   ;;  %s5090_s24 = smov 192  }
  0x5e   : > { %4299 = dma.hbm_to_vmem [thread:$0]  (!%p5236_p10), %s5243_s21, 6144, %s5245_s26, %s5247_s27, %s5089_s17, %s5089_s17, %s5090_s24  }
  0x5f   : > { %p5491_p0 = scmp.ne.s32.totalorder %s5486_s20, 0 }
  0x60   : > { %s5278_s28 = sand.u32 (!%p5491_p0), 1, %s5074_s13   ;;  %p5492_p5 = scmp.ne.s32.totalorder (!%p5491_p0), %s5484_s18, 0 }
  0x61   : > { %180 = sbr.rel (%p5491_p0) target bundleno = 751 (0x2ef), region = 32  ;;  %s183_s29 = scalar_lea.sflag (!%p5491_p0), [#allocation3], %s5278_s28 }
  0x62   : > { %s4276_s22 = smul.u32 (!%p5491_p0), 384, %s5278_s28 }
  0x64   : > { %s5282_s30 = scalar_lea.vmem (!%p5491_p0), [#allocation2], %s4276_s22 }
  0x68   : > { %5057 = dma.done.wait (%p5492_p5), %s183_s29, 6144  }
  0x69   : > { %5059 = vsyncadd (%p5492_p5), %s183_s29, 4294961152  ;;  %p5493_p10 = scmp.eq.s32.totalorder %s5135_s16, 0 }
  0x6b   : > { %5061 = dma.done.wait (%p5493_p10), [#allocation6], 49184   ;;  %p5494_p11 = pmov %p5493_p10 }
  0x6c   : > { %v4350_v0 = vld [vmem:[#allocation5 + $0x4] ss:$8 sps:$4 sm:$0xff]   ;;  %v4354_v2 = vld [vmem:[#allocation5] ss:$8 sps:$4 sm:$0xff]   ;;  %v4356_v4 = vld [vmem:[#allocation5 + $0x14] ss:$8 sps:$4 sm:$0xff]  }
  0x6d   : > { %5063 = vsyncadd (%p5494_p11), [#allocation6], 4294918112  ;;  %v4352_v1 = vld [vmem:[#allocation5 + $0x604] ss:$8 sps:$4 sm:$0xff]   ;;  %2679 = vmatprep.subr.bf16.mxu1 %v4350_v0  ;;  %v4355_v3 = vld [vmem:[#allocation5 + $0x600] ss:$8 sps:$4 sm:$0xff]  }
  0x6e   : > { %3117 = vmatprep.subr.bf16.mxu0 %v4352_v1  ;;  %2680 = vmatpush1.bf16.msra.mxu1 %v4354_v2  ;;  %v4358_v5 = vld [vmem:[#allocation5 + $0x614] ss:$8 sps:$4 sm:$0xff]   ;;  %v4360_v6 = vld [vmem:[#allocation5 + $0x10] ss:$8 sps:$4 sm:$0xff]   ;;  %v4362_v8 = vld [vmem:[#allocation5 + $0x24] ss:$8 sps:$4 sm:$0xff]  }
  0x6f   : > { %3118 = vmatpush1.bf16.msra.mxu0 %v4355_v3  ;;  %2681 = vmatprep.subr.bf16.mxu1 %v4356_v4  ;;  %v4361_v7 = vld [vmem:[#allocation5 + $0x610] ss:$8 sps:$4 sm:$0xff]   ;;  %v4364_v9 = vld [vmem:[#allocation5 + $0x624] ss:$8 sps:$4 sm:$0xff]   ;;  %v4366_v10 = vld [vmem:[#allocation5 + $0x20] ss:$8 sps:$4 sm:$0xff]  }
  0x70   : > { %3119 = vmatprep.subr.bf16.mxu0 %v4358_v5  ;;  %v4367_v11 = vld [vmem:[#allocation5 + $0x620] ss:$8 sps:$4 sm:$0xff]   ;;  %v4368_v12 = vld [vmem:[#allocation5 + $0x34] ss:$8 sps:$4 sm:$0xff]   ;;  %v4372_v14 = vld [vmem:[#allocation5 + $0x30] ss:$8 sps:$4 sm:$0xff]  }
  0x71   : > { %v4370_v13 = vld [vmem:[#allocation5 + $0x634] ss:$8 sps:$4 sm:$0xff]   ;;  %v4373_v15 = vld [vmem:[#allocation5 + $0x630] ss:$8 sps:$4 sm:$0xff]   ;;  %v4374_v16 = vld [vmem:[#allocation5 + $0x44] ss:$8 sps:$4 sm:$0xff]  }
  0x72   : > { %2682 = vmatpush1.bf16.msra.mxu1 %v4360_v6  ;;  %v4376_v17 = vld [vmem:[#allocation5 + $0x644] ss:$8 sps:$4 sm:$0xff]   ;;  %v4378_v18 = vld [vmem:[#allocation5 + $0x40] ss:$8 sps:$4 sm:$0xff]   ;;  %v4380_v20 = vld [vmem:[#allocation5 + $0x54] ss:$8 sps:$4 sm:$0xff]  }
  0x73   : > { %3120 = vmatpush1.bf16.msra.mxu0 %v4361_v7  ;;  %2683 = vmatprep.subr.bf16.mxu1 %v4362_v8  ;;  %v4379_v19 = vld [vmem:[#allocation5 + $0x640] ss:$8 sps:$4 sm:$0xff]   ;;  %v4382_v21 = vld [vmem:[#allocation5 + $0x654] ss:$8 sps:$4 sm:$0xff]   ;;  %v4384_v22 = vld [vmem:[#allocation5 + $0x50] ss:$8 sps:$4 sm:$0xff]  }
  0x74   : > { %3121 = vmatprep.subr.bf16.mxu0 %v4364_v9  ;;  %v4385_v23 = vld [vmem:[#allocation5 + $0x650] ss:$8 sps:$4 sm:$0xff]   ;;  %v4386_v24 = vld [vmem:[#allocation5 + $0x64] ss:$8 sps:$4 sm:$0xff]   ;;  %v4390_v26 = vld [vmem:[#allocation5 + $0x60] ss:$8 sps:$4 sm:$0xff]  }
  0x75   : > { %v4388_v25 = vld [vmem:[#allocation5 + $0x664] ss:$8 sps:$4 sm:$0xff]   ;;  %v4391_v27 = vld [vmem:[#allocation5 + $0x660] ss:$8 sps:$4 sm:$0xff]   ;;  %v4392_v28 = vld [vmem:[#allocation5 + $0x74] ss:$8 sps:$4 sm:$0xff]  }
  0x76   : > { %2684 = vmatpush1.bf16.msra.mxu1 %v4366_v10  ;;  %v4394_v29 = vld [vmem:[#allocation5 + $0x674] ss:$8 sps:$4 sm:$0xff]   ;;  %v4396_v30 = vld [vmem:[#allocation5 + $0x70] ss:$8 sps:$4 sm:$0xff]   ;;  %v4398_v32 = vld [vmem:[#allocation5 + $0x84] ss:$8 sps:$4 sm:$0xff]  }
  0x77   : > { %3122 = vmatpush1.bf16.msra.mxu0 %v4367_v11  ;;  %2685 = vmatprep.subr.bf16.mxu1 %v4368_v12  ;;  %v4397_v31 = vld [vmem:[#allocation5 + $0x670] ss:$8 sps:$4 sm:$0xff]   ;;  %v4400_v33 = vld [vmem:[#allocation5 + $0x684] ss:$8 sps:$4 sm:$0xff]   ;;  %v4402_v34 = vld [vmem:[#allocation5 + $0x80] ss:$8 sps:$4 sm:$0xff]  }
  0x78   : > { %3123 = vmatprep.subr.bf16.mxu0 %v4370_v13  ;;  %v4403_v35 = vld [vmem:[#allocation5 + $0x680] ss:$8 sps:$4 sm:$0xff]   ;;  %v4404_v36 = vld [vmem:[#allocation5 + $0x94] ss:$8 sps:$4 sm:$0xff]   ;;  %v4408_v38 = vld [vmem:[#allocation5 + $0x90] ss:$8 sps:$4 sm:$0xff]  }
  0x79   : > { %v4406_v37 = vld [vmem:[#allocation5 + $0x694] ss:$8 sps:$4 sm:$0xff]   ;;  %v4409_v39 = vld [vmem:[#allocation5 + $0x690] ss:$8 sps:$4 sm:$0xff]   ;;  %v4410_v40 = vld [vmem:[#allocation5 + $0xa4] ss:$8 sps:$4 sm:$0xff]  }
  0x7a   : > { %2686 = vmatpush1.bf16.msra.mxu1 %v4372_v14  ;;  %v4412_v41 = vld [vmem:[#allocation5 + $0x6a4] ss:$8 sps:$4 sm:$0xff]   ;;  %v4414_v42 = vld [vmem:[#allocation5 + $0xa0] ss:$8 sps:$4 sm:$0xff]   ;;  %v4416_v44 = vld [vmem:[#allocation5 + $0xb4] ss:$8 sps:$4 sm:$0xff]  }
  0x7b   : > { %3124 = vmatpush1.bf16.msra.mxu0 %v4373_v15  ;;  %2687 = vmatprep.subr.bf16.mxu1 %v4374_v16  ;;  %v4415_v43 = vld [vmem:[#allocation5 + $0x6a0] ss:$8 sps:$4 sm:$0xff]   ;;  %v4418_v45 = vld [vmem:[#allocation5 + $0x6b4] ss:$8 sps:$4 sm:$0xff]   ;;  %v4420_v47 = vld [vmem:[#allocation5 + $0xb0] ss:$8 sps:$4 sm:$0xff]  }
  0x7c   : > { %3125 = vmatprep.subr.bf16.mxu0 %v4376_v17  ;;  %v5293_v46 = vld [vmem:[%s5282_s30 + $0x8] sm:$0xff]  ;;  %v4421_v49 = vld [vmem:[#allocation5 + $0x6b0] ss:$8 sps:$4 sm:$0xff]   ;;  %v4428_v56 = vld [vmem:[#allocation5 + $0xd4] ss:$8 sps:$4 sm:$0xff]   ;;  %s3689_s18 = sshll.u32 %s5278_s28, 7 }
  0x7d   : > { %v268_v48 = vunpack.c.l.u8.bf16 %v5293_v46  ;;  %v5297_v50 = vld [vmem:[%s5282_s30 + $0x68] sm:$0xff]  ;;  %v4430_v57 = vld [vmem:[#allocation5 + $0x6d4] ss:$8 sps:$4 sm:$0xff]   ;;  %v4432_v58 = vld [vmem:[#allocation5 + $0xd0] ss:$8 sps:$4 sm:$0xff]   ;;  %v292_v14 = vunpack.c.h.u8.bf16 %v5293_v46  ;;  %s5397_s20 = scalar_lea.vmem [#allocation8], %s3689_s18 }
  0x7e   : > { %2688 = vmatpush1.bf16.msra.mxu1 %v4378_v18  ;;  %v4422_v51 = vld [vmem:[#allocation5 + $0xc4] ss:$8 sps:$4 sm:$0xff]   ;;  %v280_v53 = vunpack.c.l.u8.bf16 %v5297_v50  ;;  %v4426_v54 = vld [vmem:[#allocation5 + $0xc0] ss:$8 sps:$4 sm:$0xff]   ;;  %v4433_v59 = vld [vmem:[#allocation5 + $0x6d0] ss:$8 sps:$4 sm:$0xff]   ;;  %v304_v15 = vunpack.c.h.u8.bf16 %v5297_v50 }
  0x7f   : > { %3126 = vmatpush1.bf16.msra.mxu0 %v4379_v19  ;;  %2689 = vmatprep.subr.bf16.mxu1 %v4380_v20  ;;  %v4424_v52 = vld [vmem:[#allocation5 + $0x6c4] ss:$8 sps:$4 sm:$0xff]   ;;  %v4427_v55 = vld [vmem:[#allocation5 + $0x6c0] ss:$8 sps:$4 sm:$0xff]   ;;  %v4440_v0 = vld [vmem:[#allocation5 + $0xf4] ss:$8 sps:$4 sm:$0xff]  }
  0x80   : > { %3127 = vmatprep.subr.bf16.mxu0 %v4382_v21  ;;  %2711 = vmatprep.mubr.bf16.mxu1 %v268_v48  ;;  %v4434_v60 = vld [vmem:[#allocation5 + $0xe4] ss:$8 sps:$4 sm:$0xff]   ;;  %v4438_v62 = vld [vmem:[#allocation5 + $0xe0] ss:$8 sps:$4 sm:$0xff]   ;;  %v4442_v1 = vld [vmem:[#allocation5 + $0x6f4] ss:$8 sps:$4 sm:$0xff]  }
  0x81   : > { %3149 = vmatprep.mubr.bf16.mxu0 %v280_v53  ;;  %v4436_v61 = vld [vmem:[#allocation5 + $0x6e4] ss:$8 sps:$4 sm:$0xff]   ;;  %v4439_v63 = vld [vmem:[#allocation5 + $0x6e0] ss:$8 sps:$4 sm:$0xff]   ;;  %v4444_v2 = vld [vmem:[#allocation5 + $0xf0] ss:$8 sps:$4 sm:$0xff]  }
  0x82   : > { %2690 = vmatpush1.bf16.msra.mxu1 %v4384_v22  ;;  %v4445_v3 = vld [vmem:[#allocation5 + $0x6f0] ss:$8 sps:$4 sm:$0xff]   ;;  %v4448_v4 = vld [vmem:[#allocation5 + $0x104] ss:$8 sps:$4 sm:$0xff]   ;;  %v4446_v8 = vld [vmem:[#allocation5 + $0x100] ss:$8 sps:$4 sm:$0xff]  }
  0x83   : > { %3128 = vmatpush1.bf16.msra.mxu0 %v4385_v23  ;;  %2691 = vmatprep.subr.bf16.mxu1 %v4386_v24  ;;  %v219_v5 = vld [vmem:[%s5282_s30] sm:$0xff]  ;;  %v4454_v12 = vld [vmem:[#allocation5 + $0x114] ss:$8 sps:$4 sm:$0xff]   ;;  %v4452_v16 = vld [vmem:[#allocation5 + $0x110] ss:$8 sps:$4 sm:$0xff]   ;;  %s4081_s10 = sshll.u32 %s5135_s16, 11 }
  0x84   : > { %3129 = vmatprep.subr.bf16.mxu0 %v4388_v25  ;;  %v231_v6 = vld [vmem:[%s5282_s30 + $0x60] sm:$0xff]  ;;  %v267_v10 = vunpack.c.l.u8.bf16 %v219_v5  ;;  %v4457_v13 = vld [vmem:[#allocation5 + $0x714] ss:$8 sps:$4 sm:$0xff]   ;;  %v4455_v17 = vld [vmem:[#allocation5 + $0x710] ss:$8 sps:$4 sm:$0xff]   ;;  %v291_v22 = vunpack.c.h.u8.bf16 %v219_v5  ;;  %s3586_s21 = sshll.u32 %s5397_s20, 4  ;;  %s5429_s23 = scalar_lea.hbm %s5480_s3, %s4081_s10  ;;  %s5431_s21 = int_to_ptr.vmem [resolvable:$true] %s3586_s21 }
  0x85   : > { %v4451_v7 = vld [vmem:[#allocation5 + $0x704] ss:$8 sps:$4 sm:$0xff]   ;;  %v4449_v9 = vld [vmem:[#allocation5 + $0x700] ss:$8 sps:$4 sm:$0xff]   ;;  %v279_v11 = vunpack.c.l.u8.bf16 %v231_v6  ;;  %v303_v23 = vunpack.c.h.u8.bf16 %v231_v6  ;;  %v4466_v24 = vld [vmem:[#allocation5 + $0x134] ss:$8 sps:$4 sm:$0xff]  }
  0x86   : > { %2692 = vmatpush1.bf16.msra.mxu1 %v4390_v26  ;;  %v4460_v18 = vld [vmem:[#allocation5 + $0x124] ss:$8 sps:$4 sm:$0xff]   ;;  %v4458_v20 = vld [vmem:[#allocation5 + $0x120] ss:$8 sps:$4 sm:$0xff]   ;;  %v4469_v25 = vld [vmem:[#allocation5 + $0x734] ss:$8 sps:$4 sm:$0xff]  }
  0x87   : > { %3130 = vmatpush1.bf16.msra.mxu0 %v4391_v27  ;;  %2693 = vmatprep.subr.bf16.mxu1 %v4392_v28  ;;  %v4463_v19 = vld [vmem:[#allocation5 + $0x724] ss:$8 sps:$4 sm:$0xff]   ;;  %v4461_v21 = vld [vmem:[#allocation5 + $0x720] ss:$8 sps:$4 sm:$0xff]   ;;  %v4464_v26 = vld [vmem:[#allocation5 + $0x130] ss:$8 sps:$4 sm:$0xff]  }
  0x88   : > { %3131 = vmatprep.subr.bf16.mxu0 %v4394_v29  ;;  %v4467_v27 = vld [vmem:[#allocation5 + $0x730] ss:$8 sps:$4 sm:$0xff]   ;;  %v244_v28 = vld [vmem:[%s5282_s30 + $0xc8] sm:$0xff]  ;;  %v4490_v53 = vld [vmem:[#allocation5 + $0x174] ss:$8 sps:$4 sm:$0xff]   ;;  %s3572_s16 = scalar_lea.sflag [#allocation4], %s5278_s28 }
  0x89   : > { %v4472_v29 = vld [vmem:[#allocation5 + $0x144] ss:$8 sps:$4 sm:$0xff]   ;;  %v4482_v48 = vld [vmem:[#allocation5 + $0x160] ss:$8 sps:$4 sm:$0xff]   ;;  %s5012_s5 = scalar_lea.vmem %s5431_s21, 2048  ;;  %s5091_s8 = smov [#allocation8]  }
  0x8a   : > { %2694 = vmatpush1.bf16.msra.mxu1 %v4396_v30  ;;  %v4475_v30 = vld [vmem:[#allocation5 + $0x744] ss:$8 sps:$4 sm:$0xff]   ;;  %v4506_v6 = vld [vmem:[#allocation5 + $0x1a0] ss:$8 sps:$4 sm:$0xff]   ;;  %p5013_p1 = scmp.ne.s32.totalorder %s5431_s21, %s5012_s5  ;;  %s5016_s9 = sshll.u32 %s5091_s8, 4  ;;  %s5017_s9 = int_to_ptr.vmem [resolvable:$false] %s5016_s9 }
  0x8b   : > { %3132 = vmatpush1.bf16.msra.mxu0 %v4397_v31  ;;  %2695 = vmatprep.subr.bf16.mxu1 %v4398_v32  ;;  %v316_v31 = vunpack.c.l.u8.bf16 %v244_v28  ;;  %v256_v32 = vld [vmem:[%s5282_s30 + $0x128] sm:$0xff]  ;;  %s5018_s25 = scalar_lea.vmem %s5017_s9, 4096  ;;  %p5019_p8 = scmp.lt.s32.totalorder %s5431_s21, %s5017_s9 }
  0x8c   : > { %3133 = vmatprep.subr.bf16.mxu0 %v4400_v33  ;;  %v4470_v33 = vld [vmem:[#allocation5 + $0x140] ss:$8 sps:$4 sm:$0xff]   ;;  %v4484_v46 = vld [vmem:[#allocation5 + $0x164] ss:$8 sps:$4 sm:$0xff]   ;;  %p5014_p2 = pnand %p5013_p1, %p5226_p4  ;;  %p5020_p13 = scmp.lt.s32.totalorder %s5018_s25, %s5012_s5 }
  0x8d   : > { %v4511_v5 = vld [vmem:[#allocation5 + $0x7a4] ss:$8 sps:$4 sm:$0xff]  }
  0x8e   : > { %2696 = vmatpush1.bf16.msra.mxu1 %v4402_v34  ;;  %v328_v34 = vunpack.c.l.u8.bf16 %v256_v32  ;;  %p5015_p6 = pneg %p5014_p2  ;;  %p5021_p3 = por %p5020_p13, %p5019_p8 }
  0x8f   : > { %3134 = vmatpush1.bf16.msra.mxu0 %v4403_v35  ;;  %2697 = vmatprep.subr.bf16.mxu1 %v4404_v36  ;;  %v4473_v35 = vld [vmem:[#allocation5 + $0x740] ss:$8 sps:$4 sm:$0xff]  }
  0x90   : > { %3135 = vmatprep.subr.bf16.mxu0 %v4406_v37  ;;  %v243_v36 = vld [vmem:[%s5282_s30 + $0xc0] sm:$0xff]  ;;  %p5022_p7 = pnand %p5021_p3, %p5015_p6 }
  0x91   : > { %v255_v37 = vld [vmem:[%s5282_s30 + $0x120] sm:$0xff]  ;;  %v339_v50 = vunpack.c.h.u8.bf16 %v243_v36 }
  0x92   : > { %2698 = vmatpush1.bf16.msra.mxu1 %v4408_v38  ;;  %v4478_v38 = vld [vmem:[#allocation5 + $0x154] ss:$8 sps:$4 sm:$0xff]  }
  0x93   : > { %3136 = vmatpush1.bf16.msra.mxu0 %v4409_v39  ;;  %2699 = vmatprep.subr.bf16.mxu1 %v4410_v40  ;;  %v315_v39 = vunpack.c.l.u8.bf16 %v243_v36  ;;  %v327_v40 = vunpack.c.l.u8.bf16 %v255_v37  ;;  %v4550_v36 = vld [vmem:[#allocation5 + $0x214] ss:$8 sps:$4 sm:$0xff]  }
  0x94   : > { %3137 = vmatprep.subr.bf16.mxu0 %v4412_v41  ;;  %v4481_v41 = vld [vmem:[#allocation5 + $0x754] ss:$8 sps:$4 sm:$0xff]  }
  0x96   : > { %2700 = vmatpush1.bf16.msra.mxu1 %v4414_v42  ;;  %v340_v42 = vunpack.c.h.u8.bf16 %v244_v28  ;;  %v4544_v28 = vld [vmem:[#allocation5 + $0x204] ss:$8 sps:$4 sm:$0xff]  }
  0x97   : > { %3138 = vmatpush1.bf16.msra.mxu0 %v4415_v43  ;;  %2701 = vmatprep.subr.bf16.mxu1 %v4416_v44  ;;  %v352_v43 = vunpack.c.h.u8.bf16 %v256_v32  ;;  %v4476_v44 = vld [vmem:[#allocation5 + $0x150] ss:$8 sps:$4 sm:$0xff]   ;;  %v4542_v32 = vld [vmem:[#allocation5 + $0x200] ss:$8 sps:$4 sm:$0xff]  }
  0x98   : > { %3139 = vmatprep.subr.bf16.mxu0 %v4418_v45  ;;  %v4479_v45 = vld [vmem:[#allocation5 + $0x750] ss:$8 sps:$4 sm:$0xff]  }
  0x9a   : > { %2702 = vmatpush1.bf16.msra.mxu1 %v4420_v47  ;;  %v4487_v47 = vld [vmem:[#allocation5 + $0x764] ss:$8 sps:$4 sm:$0xff]  }
  0x9b   : > { %3140 = vmatpush1.bf16.msra.mxu0 %v4421_v49  ;;  %2703 = vmatprep.subr.bf16.mxu1 %v4422_v51  ;;  %v4485_v49 = vld [vmem:[#allocation5 + $0x760] ss:$8 sps:$4 sm:$0xff]   ;;  %v351_v51 = vunpack.c.h.u8.bf16 %v255_v37  ;;  %v4553_v37 = vld [vmem:[#allocation5 + $0x814] ss:$8 sps:$4 sm:$0xff]  }
  0x9c   : > { %3141 = vmatprep.subr.bf16.mxu0 %v4424_v52  ;;  %v5309_v52 = vld [vmem:[%s5282_s30 + $0x18] sm:$0xff] }
  0x9e   : > { %2704 = vmatpush1.bf16.msra.mxu1 %v4426_v54  ;;  %v4493_v54 = vld [vmem:[#allocation5 + $0x774] ss:$8 sps:$4 sm:$0xff]  }
  0x9f   : > { %3142 = vmatpush1.bf16.msra.mxu0 %v4427_v55  ;;  %2705 = vmatprep.subr.bf16.mxu1 %v4428_v56  ;;  %v5312_v55 = vld [vmem:[%s5282_s30 + $0x78] sm:$0xff]  ;;  %v270_v56 = vunpack.c.l.u8.bf16 %v5309_v52 }
  0xa0   : > { %3143 = vmatprep.subr.bf16.mxu0 %v4430_v57  ;;  %v282_v57 = vunpack.c.l.u8.bf16 %v5312_v55 }
  0xa2   : > { %2706 = vmatpush1.bf16.msra.mxu1 %v4432_v58  ;;  %v4488_v58 = vld [vmem:[#allocation5 + $0x170] ss:$8 sps:$4 sm:$0xff]  }
  0xa3   : > { %3144 = vmatpush1.bf16.msra.mxu0 %v4433_v59  ;;  %2707 = vmatprep.subr.bf16.mxu1 %v4434_v60  ;;  %v4491_v59 = vld [vmem:[#allocation5 + $0x770] ss:$8 sps:$4 sm:$0xff]   ;;  %v4496_v60 = vld [vmem:[#allocation5 + $0x184] ss:$8 sps:$4 sm:$0xff]  }
  0xa4   : > { %3145 = vmatprep.subr.bf16.mxu0 %v4436_v61  ;;  %v4499_v61 = vld [vmem:[#allocation5 + $0x784] ss:$8 sps:$4 sm:$0xff]  }
  0xa6   : > { %2708 = vmatpush1.bf16.msra.mxu1 %v4438_v62  ;;  %v4494_v62 = vld [vmem:[#allocation5 + $0x180] ss:$8 sps:$4 sm:$0xff]  }
  0xa7   : > { %3146 = vmatpush1.bf16.msra.mxu0 %v4439_v63  ;;  %2709 = vmatprep.subr.bf16.mxu1 %v4440_v0  ;;  %v4497_v63 = vld [vmem:[#allocation5 + $0x780] ss:$8 sps:$4 sm:$0xff]   ;;  %v4502_v0 = vld [vmem:[#allocation5 + $0x194] ss:$8 sps:$4 sm:$0xff]  }
  0xa8   : > { %3147 = vmatprep.subr.bf16.mxu0 %v4442_v1  ;;  %v4505_v1 = vld [vmem:[#allocation5 + $0x794] ss:$8 sps:$4 sm:$0xff]  }
  0xaa   : > { %2710 = vmatpush1.bf16.msra.mxu1 %v4444_v2  ;;  %v4500_v2 = vld [vmem:[#allocation5 + $0x190] ss:$8 sps:$4 sm:$0xff]  }
  0xab   : > { %3148 = vmatpush1.bf16.msra.mxu0 %v4445_v3  ;;  %2752 = vmatprep.subr.bf16.mxu1 %v4448_v4  ;;  %v4503_v3 = vld [vmem:[#allocation5 + $0x790] ss:$8 sps:$4 sm:$0xff]   ;;  %v4508_v4 = vld [vmem:[#allocation5 + $0x1a4] ss:$8 sps:$4 sm:$0xff]  }
  0xac   : > { %3190 = vmatprep.subr.bf16.mxu0 %v4451_v7  ;;  %v4509_v7 = vld [vmem:[#allocation5 + $0x7a0] ss:$8 sps:$4 sm:$0xff]  }
  0xad   : > { %2712 = vmatmul.mubr.bf16.vlgmr.msra.gmra.mrb[0].mxu1 %v267_v10  ;;  %v4512_v10 = vld [vmem:[#allocation5 + $0x1b0] ss:$8 sps:$4 sm:$0xff]  }
  0xae   : > { %3150 = vmatmul.mubr.bf16.vlgmr.msra.gmra.mrb[0].mxu0 %v279_v11  ;;  %2753 = vmatpush1.bf16.msra.mxu1 %v4446_v8  ;;  %v4514_v8 = vld [vmem:[#allocation5 + $0x1b4] ss:$8 sps:$4 sm:$0xff]   ;;  %v4515_v11 = vld [vmem:[#allocation5 + $0x7b0] ss:$8 sps:$4 sm:$0xff]  }
  0xaf   : > { %3191 = vmatpush1.bf16.msra.mxu0 %v4449_v9  ;;  %2754 = vmatprep.subr.bf16.mxu1 %v4454_v12  ;;  %v4517_v9 = vld [vmem:[#allocation5 + $0x7b4] ss:$8 sps:$4 sm:$0xff]   ;;  %v4520_v12 = vld [vmem:[#allocation5 + $0x1c4] ss:$8 sps:$4 sm:$0xff]  }
  0xb0   : > { %3192 = vmatprep.subr.bf16.mxu0 %v4457_v13  ;;  %2721 = vmatprep.mubr.bf16.mxu1 %v292_v14  ;;  %v4523_v13 = vld [vmem:[#allocation5 + $0x7c4] ss:$8 sps:$4 sm:$0xff]   ;;  %v4518_v14 = vld [vmem:[#allocation5 + $0x1c0] ss:$8 sps:$4 sm:$0xff]  }
  0xb1   : > { %3159 = vmatprep.mubr.bf16.mxu0 %v304_v15  ;;  %v4521_v15 = vld [vmem:[#allocation5 + $0x7c0] ss:$8 sps:$4 sm:$0xff]  }
  0xb2   : > { %2755 = vmatpush1.bf16.msra.mxu1 %v4452_v16  ;;  %v4526_v16 = vld [vmem:[#allocation5 + $0x1d4] ss:$8 sps:$4 sm:$0xff]  }
  0xb3   : > { %3193 = vmatpush1.bf16.msra.mxu0 %v4455_v17  ;;  %2756 = vmatprep.subr.bf16.mxu1 %v4460_v18  ;;  %v4529_v17 = vld [vmem:[#allocation5 + $0x7d4] ss:$8 sps:$4 sm:$0xff]   ;;  %v4524_v18 = vld [vmem:[#allocation5 + $0x1d0] ss:$8 sps:$4 sm:$0xff]  }
  0xb4   : > { %3194 = vmatprep.subr.bf16.mxu0 %v4463_v19  ;;  %v4527_v19 = vld [vmem:[#allocation5 + $0x7d0] ss:$8 sps:$4 sm:$0xff]  }
  0xb5   : > { %2722 = vmatmul.mubr.bf16.gmra.mrb[4].mxu1 %v291_v22  ;;  %v4530_v22 = vld [vmem:[#allocation5 + $0x1e0] ss:$8 sps:$4 sm:$0xff]  }
  0xb6   : > { %3160 = vmatmul.mubr.bf16.gmra.mrb[4].mxu0 %v303_v23  ;;  %2757 = vmatpush1.bf16.msra.mxu1 %v4458_v20  ;;  %v4532_v20 = vld [vmem:[#allocation5 + $0x1e4] ss:$8 sps:$4 sm:$0xff]   ;;  %v4533_v23 = vld [vmem:[#allocation5 + $0x7e0] ss:$8 sps:$4 sm:$0xff]  }
  0xb7   : > { %3195 = vmatpush1.bf16.msra.mxu0 %v4461_v21  ;;  %2758 = vmatprep.subr.bf16.mxu1 %v4466_v24  ;;  %v4535_v21 = vld [vmem:[#allocation5 + $0x7e4] ss:$8 sps:$4 sm:$0xff]   ;;  %v4538_v24 = vld [vmem:[#allocation5 + $0x1f4] ss:$8 sps:$4 sm:$0xff]  }
  0xb8   : > { %3196 = vmatprep.subr.bf16.mxu0 %v4469_v25  ;;  %2731 = vmatprep.mubr.bf16.mxu1 %v316_v31  ;;  %v4541_v25 = vld [vmem:[#allocation5 + $0x7f4] ss:$8 sps:$4 sm:$0xff]   ;;  %v4547_v31 = vld [vmem:[#allocation5 + $0x804] ss:$8 sps:$4 sm:$0xff]  }
  0xb9   : > { %3169 = vmatprep.mubr.bf16.mxu0 %v328_v34 }
  0xba   : > { %2759 = vmatpush1.bf16.msra.mxu1 %v4464_v26  ;;  %v4536_v26 = vld [vmem:[#allocation5 + $0x1f0] ss:$8 sps:$4 sm:$0xff]  }
  0xbb   : > { %3197 = vmatpush1.bf16.msra.mxu0 %v4467_v27  ;;  %2760 = vmatprep.subr.bf16.mxu1 %v4472_v29  ;;  %v4539_v27 = vld [vmem:[#allocation5 + $0x7f0] ss:$8 sps:$4 sm:$0xff]  }
  0xbc   : > { %3198 = vmatprep.subr.bf16.mxu0 %v4475_v30  ;;  %v221_v29 = vld [vmem:[%s5282_s30 + $0x10] sm:$0xff] }
  0xbd   : > { %2732 = vmatmul.mubr.bf16.gmra.mrb[8].mxu1 %v315_v39  ;;  %v233_v30 = vld [vmem:[%s5282_s30 + $0x70] sm:$0xff]  ;;  %v269_v34 = vunpack.c.l.u8.bf16 %v221_v29  ;;  %v306_v39 = vunpack.c.h.u8.bf16 %v5312_v55 }
  0xbe   : > { %3170 = vmatmul.mubr.bf16.gmra.mrb[8].mxu0 %v327_v40  ;;  %2761 = vmatpush1.bf16.msra.mxu1 %v4470_v33  ;;  %v4545_v33 = vld [vmem:[#allocation5 + $0x800] ss:$8 sps:$4 sm:$0xff]   ;;  %v4548_v40 = vld [vmem:[#allocation5 + $0x210] ss:$8 sps:$4 sm:$0xff]  }
  0xbf   : > { %3199 = vmatpush1.bf16.msra.mxu0 %v4473_v35  ;;  %2762 = vmatprep.subr.bf16.mxu1 %v4478_v38  ;;  %v281_v35 = vunpack.c.l.u8.bf16 %v233_v30  ;;  %v294_v38 = vunpack.c.h.u8.bf16 %v5309_v52  ;;  %v4560_v52 = vld [vmem:[#allocation5 + $0x230] ss:$8 sps:$4 sm:$0xff]  }
  0xc0   : > { %3200 = vmatprep.subr.bf16.mxu0 %v4481_v41  ;;  %2741 = vmatprep.mubr.bf16.mxu1 %v340_v42  ;;  %v4551_v41 = vld [vmem:[#allocation5 + $0x810] ss:$8 sps:$4 sm:$0xff]   ;;  %v4556_v42 = vld [vmem:[#allocation5 + $0x224] ss:$8 sps:$4 sm:$0xff]  }
  0xc1   : > { %3179 = vmatprep.mubr.bf16.mxu0 %v352_v43  ;;  %v4559_v43 = vld [vmem:[#allocation5 + $0x824] ss:$8 sps:$4 sm:$0xff]  }
  0xc2   : > { %2763 = vmatpush1.bf16.msra.mxu1 %v4476_v44  ;;  %v246_v44 = vld [vmem:[%s5282_s30 + $0xd8] sm:$0xff] }
  0xc3   : > { %3201 = vmatpush1.bf16.msra.mxu0 %v4479_v45  ;;  %2764 = vmatprep.subr.bf16.mxu1 %v4484_v46  ;;  %v293_v45 = vunpack.c.h.u8.bf16 %v221_v29  ;;  %v305_v46 = vunpack.c.h.u8.bf16 %v233_v30  ;;  %v4607_v29 = vld [vmem:[#allocation5 + $0x8a4] ss:$8 sps:$4 sm:$0xff]   ;;  %v4602_v30 = vld [vmem:[#allocation5 + $0x2a0] ss:$8 sps:$4 sm:$0xff]  }
  0xc4   : > { %3202 = vmatprep.subr.bf16.mxu0 %v4487_v47  ;;  %v258_v47 = vld [vmem:[%s5282_s30 + $0x138] sm:$0xff] }
  0xc5   : > { %2742 = vmatmul.mubr.bf16.gmra.mrb[12].mxu1 %v339_v50  ;;  %v4562_v50 = vld [vmem:[#allocation5 + $0x234] ss:$8 sps:$4 sm:$0xff]   ;;  %v330_v55 = vunpack.c.l.u8.bf16 %v258_v47 }
  0xc6   : > { %3180 = vmatmul.mubr.bf16.gmra.mrb[12].mxu0 %v351_v51  ;;  %2765 = vmatpush1.bf16.msra.mxu1 %v4482_v48  ;;  %v4554_v48 = vld [vmem:[#allocation5 + $0x220] ss:$8 sps:$4 sm:$0xff]   ;;  %v4565_v51 = vld [vmem:[#allocation5 + $0x834] ss:$8 sps:$4 sm:$0xff]  }
  0xc7   : > { %3203 = vmatpush1.bf16.msra.mxu0 %v4485_v49  ;;  %2766 = vmatprep.subr.bf16.mxu1 %v4490_v53  ;;  %v4557_v49 = vld [vmem:[#allocation5 + $0x820] ss:$8 sps:$4 sm:$0xff]   ;;  %v4563_v53 = vld [vmem:[#allocation5 + $0x830] ss:$8 sps:$4 sm:$0xff]  }
  0xc8   : > { %3204 = vmatprep.subr.bf16.mxu0 %v4493_v54  ;;  %2784 = vmatprep.mubr.bf16.mxu1 %v270_v56  ;;  %v318_v54 = vunpack.c.l.u8.bf16 %v246_v44  ;;  %v4568_v56 = vld [vmem:[#allocation5 + $0x244] ss:$8 sps:$4 sm:$0xff]  }
  0xc9   : > { %3222 = vmatprep.mubr.bf16.mxu0 %v282_v57  ;;  %v245_v57 = vld [vmem:[%s5282_s30 + $0xd0] sm:$0xff] }
  0xca   : > { %2767 = vmatpush1.bf16.msra.mxu1 %v4488_v58  ;;  %v257_v58 = vld [vmem:[%s5282_s30 + $0x130] sm:$0xff] }
  0xcb   : > { %3205 = vmatpush1.bf16.msra.mxu0 %v4491_v59  ;;  %2768 = vmatprep.subr.bf16.mxu1 %v4496_v60  ;;  %v4571_v59 = vld [vmem:[#allocation5 + $0x844] ss:$8 sps:$4 sm:$0xff]   ;;  %v4566_v60 = vld [vmem:[#allocation5 + $0x240] ss:$8 sps:$4 sm:$0xff]  }
  0xcc   : > { %3206 = vmatprep.subr.bf16.mxu0 %v4499_v61  ;;  %v4569_v61 = vld [vmem:[#allocation5 + $0x840] ss:$8 sps:$4 sm:$0xff]  }
  0xce   : > { %2769 = vmatpush1.bf16.msra.mxu1 %v4494_v62  ;;  %v317_v62 = vunpack.c.l.u8.bf16 %v245_v57 }
  0xcf   : > { %3207 = vmatpush1.bf16.msra.mxu0 %v4497_v63  ;;  %2770 = vmatprep.subr.bf16.mxu1 %v4502_v0  ;;  %v329_v63 = vunpack.c.l.u8.bf16 %v257_v58  ;;  %v4574_v0 = vld [vmem:[#allocation5 + $0x254] ss:$8 sps:$4 sm:$0xff]  }
  0xd0   : > { %3208 = vmatprep.subr.bf16.mxu0 %v4505_v1  ;;  %v4577_v1 = vld [vmem:[#allocation5 + $0x854] ss:$8 sps:$4 sm:$0xff]  }
  0xd2   : > { %2771 = vmatpush1.bf16.msra.mxu1 %v4500_v2  ;;  %v342_v2 = vunpack.c.h.u8.bf16 %v246_v44  ;;  %v4628_v44 = vld [vmem:[#allocation5 + $0x2e4] ss:$8 sps:$4 sm:$0xff]  }
  0xd3   : > { %3209 = vmatpush1.bf16.msra.mxu0 %v4503_v3  ;;  %2772 = vmatprep.subr.bf16.mxu1 %v4508_v4  ;;  %v354_v3 = vunpack.c.h.u8.bf16 %v258_v47  ;;  %v4572_v4 = vld [vmem:[#allocation5 + $0x250] ss:$8 sps:$4 sm:$0xff]   ;;  %v4629_v47 = vld [vmem:[#allocation5 + $0x8e0] ss:$8 sps:$4 sm:$0xff]  }
  0xd4   : > { %3210 = vmatprep.subr.bf16.mxu0 %v4511_v5  ;;  %v4575_v5 = vld [vmem:[#allocation5 + $0x850] ss:$8 sps:$4 sm:$0xff]  }
  0xd6   : > { %2773 = vmatpush1.bf16.msra.mxu1 %v4506_v6  ;;  %v4580_v6 = vld [vmem:[#allocation5 + $0x264] ss:$8 sps:$4 sm:$0xff]  }
  0xd7   : > { %3211 = vmatpush1.bf16.msra.mxu0 %v4509_v7  ;;  %2774 = vmatprep.subr.bf16.mxu1 %v4514_v8  ;;  %v4583_v7 = vld [vmem:[#allocation5 + $0x864] ss:$8 sps:$4 sm:$0xff]   ;;  %v4578_v8 = vld [vmem:[#allocation5 + $0x260] ss:$8 sps:$4 sm:$0xff]  }
  0xd8   : > { %3212 = vmatprep.subr.bf16.mxu0 %v4517_v9  ;;  %v4581_v9 = vld [vmem:[#allocation5 + $0x860] ss:$8 sps:$4 sm:$0xff]  }
  0xda   : > { %2775 = vmatpush1.bf16.msra.mxu1 %v4512_v10  ;;  %v341_v10 = vunpack.c.h.u8.bf16 %v245_v57  ;;  %v4641_v57 = vld [vmem:[#allocation5 + $0x900] ss:$8 sps:$4 sm:$0xff]  }
  0xdb   : > { %3213 = vmatpush1.bf16.msra.mxu0 %v4515_v11  ;;  %2776 = vmatprep.subr.bf16.mxu1 %v4520_v12  ;;  %v353_v11 = vunpack.c.h.u8.bf16 %v257_v58  ;;  %v5325_v12 = vld [vmem:[%s5282_s30 + $0x28] sm:$0xff] }
  0xdc   : > { %3214 = vmatprep.subr.bf16.mxu0 %v4523_v13  ;;  %v5328_v13 = vld [vmem:[%s5282_s30 + $0x88] sm:$0xff] }
  0xde   : > { %2777 = vmatpush1.bf16.msra.mxu1 %v4518_v14  ;;  %v4586_v14 = vld [vmem:[#allocation5 + $0x274] ss:$8 sps:$4 sm:$0xff]  }
  0xdf   : > { %3215 = vmatpush1.bf16.msra.mxu0 %v4521_v15  ;;  %2778 = vmatprep.subr.bf16.mxu1 %v4526_v16  ;;  %v4589_v15 = vld [vmem:[#allocation5 + $0x874] ss:$8 sps:$4 sm:$0xff]   ;;  %v272_v16 = vunpack.c.l.u8.bf16 %v5325_v12 }
  0xe0   : > { %3216 = vmatprep.subr.bf16.mxu0 %v4529_v17  ;;  %v284_v17 = vunpack.c.l.u8.bf16 %v5328_v13 }
  0xe2   : > { %2779 = vmatpush1.bf16.msra.mxu1 %v4524_v18  ;;  %v4584_v18 = vld [vmem:[#allocation5 + $0x270] ss:$8 sps:$4 sm:$0xff]  }
  0xe3   : > { %3217 = vmatpush1.bf16.msra.mxu0 %v4527_v19  ;;  %2780 = vmatprep.subr.bf16.mxu1 %v4532_v20  ;;  %v4587_v19 = vld [vmem:[#allocation5 + $0x870] ss:$8 sps:$4 sm:$0xff]   ;;  %v4592_v20 = vld [vmem:[#allocation5 + $0x284] ss:$8 sps:$4 sm:$0xff]  }
  0xe4   : > { %3218 = vmatprep.subr.bf16.mxu0 %v4535_v21  ;;  %v4595_v21 = vld [vmem:[#allocation5 + $0x884] ss:$8 sps:$4 sm:$0xff]  }
  0xe6   : > { %2781 = vmatpush1.bf16.msra.mxu1 %v4530_v22  ;;  %v4590_v22 = vld [vmem:[#allocation5 + $0x280] ss:$8 sps:$4 sm:$0xff]  }
  0xe7   : > { %3219 = vmatpush1.bf16.msra.mxu0 %v4533_v23  ;;  %2782 = vmatprep.subr.bf16.mxu1 %v4538_v24  ;;  %v4593_v23 = vld [vmem:[#allocation5 + $0x880] ss:$8 sps:$4 sm:$0xff]   ;;  %v4598_v24 = vld [vmem:[#allocation5 + $0x294] ss:$8 sps:$4 sm:$0xff]  }
  0xe8   : > { %3220 = vmatprep.subr.bf16.mxu0 %v4541_v25  ;;  %v4601_v25 = vld [vmem:[#allocation5 + $0x894] ss:$8 sps:$4 sm:$0xff]  }
  0xea   : > { %2783 = vmatpush1.bf16.msra.mxu1 %v4536_v26  ;;  %v4596_v26 = vld [vmem:[#allocation5 + $0x290] ss:$8 sps:$4 sm:$0xff]  }
  0xeb   : > { %3221 = vmatpush1.bf16.msra.mxu0 %v4539_v27  ;;  %2825 = vmatprep.subr.bf16.mxu1 %v4544_v28  ;;  %v4599_v27 = vld [vmem:[#allocation5 + $0x890] ss:$8 sps:$4 sm:$0xff]   ;;  %v4604_v28 = vld [vmem:[#allocation5 + $0x2a4] ss:$8 sps:$4 sm:$0xff]  }
  0xec   : > { %3263 = vmatprep.subr.bf16.mxu0 %v4547_v31  ;;  %v4605_v31 = vld [vmem:[#allocation5 + $0x8a0] ss:$8 sps:$4 sm:$0xff]  }
  0xed   : > { %2785 = vmatmul.mubr.bf16.vlgmr.msra.gmra.mrb[0].mxu1 %v269_v34  ;;  %v4608_v34 = vld [vmem:[#allocation5 + $0x2b0] ss:$8 sps:$4 sm:$0xff]  }
  0xee   : > { %3223 = vmatmul.mubr.bf16.vlgmr.msra.gmra.mrb[0].mxu0 %v281_v35  ;;  %2826 = vmatpush1.bf16.msra.mxu1 %v4542_v32  ;;  %v4610_v32 = vld [vmem:[#allocation5 + $0x2b4] ss:$8 sps:$4 sm:$0xff]   ;;  %v4611_v35 = vld [vmem:[#allocation5 + $0x8b0] ss:$8 sps:$4 sm:$0xff]  }
  0xef   : > { %3264 = vmatpush1.bf16.msra.mxu0 %v4545_v33  ;;  %2827 = vmatprep.subr.bf16.mxu1 %v4550_v36  ;;  %v4613_v33 = vld [vmem:[#allocation5 + $0x8b4] ss:$8 sps:$4 sm:$0xff]   ;;  %v4616_v36 = vld [vmem:[#allocation5 + $0x2c4] ss:$8 sps:$4 sm:$0xff]  }
  0xf0   : > { %3265 = vmatprep.subr.bf16.mxu0 %v4553_v37  ;;  %2794 = vmatprep.mubr.bf16.mxu1 %v294_v38  ;;  %v4619_v37 = vld [vmem:[#allocation5 + $0x8c4] ss:$8 sps:$4 sm:$0xff]   ;;  %v4614_v38 = vld [vmem:[#allocation5 + $0x2c0] ss:$8 sps:$4 sm:$0xff]  }
  0xf1   : > { %3232 = vmatprep.mubr.bf16.mxu0 %v306_v39  ;;  %v4617_v39 = vld [vmem:[#allocation5 + $0x8c0] ss:$8 sps:$4 sm:$0xff]  }
  0xf2   : > { %2828 = vmatpush1.bf16.msra.mxu1 %v4548_v40  ;;  %v4622_v40 = vld [vmem:[#allocation5 + $0x2d4] ss:$8 sps:$4 sm:$0xff]  }
  0xf3   : > { %3266 = vmatpush1.bf16.msra.mxu0 %v4551_v41  ;;  %2829 = vmatprep.subr.bf16.mxu1 %v4556_v42  ;;  %v4625_v41 = vld [vmem:[#allocation5 + $0x8d4] ss:$8 sps:$4 sm:$0xff]   ;;  %v4620_v42 = vld [vmem:[#allocation5 + $0x2d0] ss:$8 sps:$4 sm:$0xff]  }
  0xf4   : > { %3267 = vmatprep.subr.bf16.mxu0 %v4559_v43  ;;  %v4623_v43 = vld [vmem:[#allocation5 + $0x8d0] ss:$8 sps:$4 sm:$0xff]  }
  0xf5   : > { %2795 = vmatmul.mubr.bf16.gmra.mrb[4].mxu1 %v293_v45  ;;  %v4631_v45 = vld [vmem:[#allocation5 + $0x8e4] ss:$8 sps:$4 sm:$0xff]  }
  0xf6   : > { %3233 = vmatmul.mubr.bf16.gmra.mrb[4].mxu0 %v305_v46  ;;  %2830 = vmatpush1.bf16.msra.mxu1 %v4554_v48  ;;  %v4626_v46 = vld [vmem:[#allocation5 + $0x2e0] ss:$8 sps:$4 sm:$0xff]   ;;  %v4634_v48 = vld [vmem:[#allocation5 + $0x2f4] ss:$8 sps:$4 sm:$0xff]  }
  0xf7   : > { %3268 = vmatpush1.bf16.msra.mxu0 %v4557_v49  ;;  %2831 = vmatprep.subr.bf16.mxu1 %v4562_v50  ;;  %v4637_v49 = vld [vmem:[#allocation5 + $0x8f4] ss:$8 sps:$4 sm:$0xff]   ;;  %v4632_v50 = vld [vmem:[#allocation5 + $0x2f0] ss:$8 sps:$4 sm:$0xff]  }
  0xf8   : > { %3269 = vmatprep.subr.bf16.mxu0 %v4565_v51  ;;  %2804 = vmatprep.mubr.bf16.mxu1 %v318_v54  ;;  %v4635_v51 = vld [vmem:[#allocation5 + $0x8f0] ss:$8 sps:$4 sm:$0xff]   ;;  %v235_v54 = vld [vmem:[%s5282_s30 + $0x80] sm:$0xff] }
  0xf9   : > { %3242 = vmatprep.mubr.bf16.mxu0 %v330_v55  ;;  %v4643_v55 = vld [vmem:[#allocation5 + $0x904] ss:$8 sps:$4 sm:$0xff]  }
  0xfa   : > { %2832 = vmatpush1.bf16.msra.mxu1 %v4560_v52  ;;  %v4640_v52 = vld [vmem:[#allocation5 + $0x304] ss:$8 sps:$4 sm:$0xff]  }
  0xfb   : > { %3270 = vmatpush1.bf16.msra.mxu0 %v4563_v53  ;;  %2833 = vmatprep.subr.bf16.mxu1 %v4568_v56  ;;  %v223_v53 = vld [vmem:[%s5282_s30 + $0x20] sm:$0xff] }
  0xfc   : > { %3271 = vmatprep.subr.bf16.mxu0 %v4571_v59  ;;  %v4638_v56 = vld [vmem:[#allocation5 + $0x300] ss:$8 sps:$4 sm:$0xff]   ;;  %v271_v58 = vunpack.c.l.u8.bf16 %v223_v53  ;;  %v283_v59 = vunpack.c.l.u8.bf16 %v235_v54 }
  0xfd   : > { %2805 = vmatmul.mubr.bf16.gmra.mrb[8].mxu1 %v317_v62  ;;  %v296_v62 = vunpack.c.h.u8.bf16 %v5325_v12  ;;  %v4656_v12 = vld [vmem:[#allocation5 + $0x330] ss:$8 sps:$4 sm:$0xff]  }
  0xfe   : > { %3243 = vmatmul.mubr.bf16.gmra.mrb[8].mxu0 %v329_v63  ;;  %2834 = vmatpush1.bf16.msra.mxu1 %v4566_v60  ;;  %v4646_v60 = vld [vmem:[#allocation5 + $0x314] ss:$8 sps:$4 sm:$0xff]   ;;  %v308_v63 = vunpack.c.h.u8.bf16 %v5328_v13  ;;  %v4659_v13 = vld [vmem:[#allocation5 + $0x930] ss:$8 sps:$4 sm:$0xff]  }
  0xff   : > { %3272 = vmatpush1.bf16.msra.mxu0 %v4569_v61  ;;  %2835 = vmatprep.subr.bf16.mxu1 %v4574_v0  ;;  %v4649_v61 = vld [vmem:[#allocation5 + $0x914] ss:$8 sps:$4 sm:$0xff]   ;;  %v4644_v0 = vld [vmem:[#allocation5 + $0x310] ss:$8 sps:$4 sm:$0xff]  }
 0x100   : > { %3273 = vmatprep.subr.bf16.mxu0 %v4577_v1  ;;  %2814 = vmatprep.mubr.bf16.mxu1 %v342_v2  ;;  %v4647_v1 = vld [vmem:[#allocation5 + $0x910] ss:$8 sps:$4 sm:$0xff]   ;;  %v4652_v2 = vld [vmem:[#allocation5 + $0x324] ss:$8 sps:$4 sm:$0xff]  }
 0x101   : > { %3252 = vmatprep.mubr.bf16.mxu0 %v354_v3  ;;  %v4655_v3 = vld [vmem:[#allocation5 + $0x924] ss:$8 sps:$4 sm:$0xff]  }
 0x102   : > { %2836 = vmatpush1.bf16.msra.mxu1 %v4572_v4  ;;  %v4650_v4 = vld [vmem:[#allocation5 + $0x320] ss:$8 sps:$4 sm:$0xff]  }
 0x103   : > { %3274 = vmatpush1.bf16.msra.mxu0 %v4575_v5  ;;  %2837 = vmatprep.subr.bf16.mxu1 %v4580_v6  ;;  %v4653_v5 = vld [vmem:[#allocation5 + $0x920] ss:$8 sps:$4 sm:$0xff]   ;;  %v295_v6 = vunpack.c.h.u8.bf16 %v223_v53  ;;  %v4703_v53 = vld [vmem:[#allocation5 + $0x9a4] ss:$8 sps:$4 sm:$0xff]  }
 0x104   : > { %3275 = vmatprep.subr.bf16.mxu0 %v4583_v7  ;;  %v307_v7 = vunpack.c.h.u8.bf16 %v235_v54  ;;  %v4698_v54 = vld [vmem:[#allocation5 + $0x3a0] ss:$8 sps:$4 sm:$0xff]  }
 0x105   : > { %2815 = vmatmul.mubr.bf16.gmra.mrb[12].mxu1 %v341_v10  ;;  %v4658_v10 = vld [vmem:[#allocation5 + $0x334] ss:$8 sps:$4 sm:$0xff]  }
 0x106   : > { %3253 = vmatmul.mubr.bf16.gmra.mrb[12].mxu0 %v353_v11  ;;  %2838 = vmatpush1.bf16.msra.mxu1 %v4578_v8  ;;  %v248_v8 = vld [vmem:[%s5282_s30 + $0xe8] sm:$0xff]  ;;  %v4661_v11 = vld [vmem:[#allocation5 + $0x934] ss:$8 sps:$4 sm:$0xff]  }
 0x107   : > { %3276 = vmatpush1.bf16.msra.mxu0 %v4581_v9  ;;  %2839 = vmatprep.subr.bf16.mxu1 %v4586_v14  ;;  %v260_v9 = vld [vmem:[%s5282_s30 + $0x148] sm:$0xff]  ;;  %v320_v14 = vunpack.c.l.u8.bf16 %v248_v8 }
 0x108   : > { %3277 = vmatprep.subr.bf16.mxu0 %v4589_v15  ;;  %2857 = vmatprep.mubr.bf16.mxu1 %v272_v16  ;;  %v332_v15 = vunpack.c.l.u8.bf16 %v260_v9  ;;  %v4664_v16 = vld [vmem:[#allocation5 + $0x344] ss:$8 sps:$4 sm:$0xff]  }
 0x109   : > { %3295 = vmatprep.mubr.bf16.mxu0 %v284_v17  ;;  %v247_v17 = vld [vmem:[%s5282_s30 + $0xe0] sm:$0xff] }
 0x10a   : > { %2840 = vmatpush1.bf16.msra.mxu1 %v4584_v18  ;;  %v259_v18 = vld [vmem:[%s5282_s30 + $0x140] sm:$0xff] }
 0x10b   : > { %3278 = vmatpush1.bf16.msra.mxu0 %v4587_v19  ;;  %2841 = vmatprep.subr.bf16.mxu1 %v4592_v20  ;;  %v4667_v19 = vld [vmem:[#allocation5 + $0x944] ss:$8 sps:$4 sm:$0xff]   ;;  %v4662_v20 = vld [vmem:[#allocation5 + $0x340] ss:$8 sps:$4 sm:$0xff]  }
 0x10c   : > { %3279 = vmatprep.subr.bf16.mxu0 %v4595_v21  ;;  %v4665_v21 = vld [vmem:[#allocation5 + $0x940] ss:$8 sps:$4 sm:$0xff]  }
 0x10e   : > { %2842 = vmatpush1.bf16.msra.mxu1 %v4590_v22  ;;  %v319_v22 = vunpack.c.l.u8.bf16 %v247_v17 }
 0x10f   : > { %3280 = vmatpush1.bf16.msra.mxu0 %v4593_v23  ;;  %2843 = vmatprep.subr.bf16.mxu1 %v4598_v24  ;;  %v331_v23 = vunpack.c.l.u8.bf16 %v259_v18  ;;  %v4670_v24 = vld [vmem:[#allocation5 + $0x354] ss:$8 sps:$4 sm:$0xff]  }
 0x110   : > { %3281 = vmatprep.subr.bf16.mxu0 %v4601_v25  ;;  %v4673_v25 = vld [vmem:[#allocation5 + $0x954] ss:$8 sps:$4 sm:$0xff]  }
 0x112   : > { %2844 = vmatpush1.bf16.msra.mxu1 %v4596_v26  ;;  %v344_v26 = vunpack.c.h.u8.bf16 %v248_v8  ;;  %v4730_v8 = vld [vmem:[#allocation5 + $0x3f4] ss:$8 sps:$4 sm:$0xff]  }
 0x113   : > { %3282 = vmatpush1.bf16.msra.mxu0 %v4599_v27  ;;  %2845 = vmatprep.subr.bf16.mxu1 %v4604_v28  ;;  %v356_v27 = vunpack.c.h.u8.bf16 %v260_v9  ;;  %v4668_v28 = vld [vmem:[#allocation5 + $0x350] ss:$8 sps:$4 sm:$0xff]   ;;  %v4733_v9 = vld [vmem:[#allocation5 + $0x9f4] ss:$8 sps:$4 sm:$0xff]  }
 0x114   : > { %3283 = vmatprep.subr.bf16.mxu0 %v4607_v29  ;;  %v4671_v29 = vld [vmem:[#allocation5 + $0x950] ss:$8 sps:$4 sm:$0xff]  }
 0x116   : > { %2846 = vmatpush1.bf16.msra.mxu1 %v4602_v30  ;;  %v4676_v30 = vld [vmem:[#allocation5 + $0x364] ss:$8 sps:$4 sm:$0xff]  }
 0x117   : > { %3284 = vmatpush1.bf16.msra.mxu0 %v4605_v31  ;;  %2847 = vmatprep.subr.bf16.mxu1 %v4610_v32  ;;  %v4679_v31 = vld [vmem:[#allocation5 + $0x964] ss:$8 sps:$4 sm:$0xff]   ;;  %v4674_v32 = vld [vmem:[#allocation5 + $0x360] ss:$8 sps:$4 sm:$0xff]  }
 0x118   : > { %3285 = vmatprep.subr.bf16.mxu0 %v4613_v33  ;;  %v4677_v33 = vld [vmem:[#allocation5 + $0x960] ss:$8 sps:$4 sm:$0xff]  }
 0x11a   : > { %2848 = vmatpush1.bf16.msra.mxu1 %v4608_v34  ;;  %v343_v34 = vunpack.c.h.u8.bf16 %v247_v17 }
 0x11b   : > { %3286 = vmatpush1.bf16.msra.mxu0 %v4611_v35  ;;  %2849 = vmatprep.subr.bf16.mxu1 %v4616_v36  ;;  %v355_v35 = vunpack.c.h.u8.bf16 %v259_v18  ;;  %v5341_v36 = vld [vmem:[%s5282_s30 + $0x38] sm:$0xff] }
 0x11c   : > { %3287 = vmatprep.subr.bf16.mxu0 %v4619_v37  ;;  %v5344_v37 = vld [vmem:[%s5282_s30 + $0x98] sm:$0xff] }
 0x11e   : > { %2850 = vmatpush1.bf16.msra.mxu1 %v4614_v38  ;;  %v4682_v38 = vld [vmem:[#allocation5 + $0x374] ss:$8 sps:$4 sm:$0xff]  }
 0x11f   : > { %3288 = vmatpush1.bf16.msra.mxu0 %v4617_v39  ;;  %2851 = vmatprep.subr.bf16.mxu1 %v4622_v40  ;;  %v4685_v39 = vld [vmem:[#allocation5 + $0x974] ss:$8 sps:$4 sm:$0xff]   ;;  %v274_v40 = vunpack.c.l.u8.bf16 %v5341_v36 }
 0x120   : > { %3289 = vmatprep.subr.bf16.mxu0 %v4625_v41  ;;  %v286_v41 = vunpack.c.l.u8.bf16 %v5344_v37 }
 0x122   : > { %2852 = vmatpush1.bf16.msra.mxu1 %v4620_v42  ;;  %v4680_v42 = vld [vmem:[#allocation5 + $0x370] ss:$8 sps:$4 sm:$0xff]  }
 0x123   : > { %3290 = vmatpush1.bf16.msra.mxu0 %v4623_v43  ;;  %2853 = vmatprep.subr.bf16.mxu1 %v4628_v44  ;;  %v4683_v43 = vld [vmem:[#allocation5 + $0x970] ss:$8 sps:$4 sm:$0xff]   ;;  %v4688_v44 = vld [vmem:[#allocation5 + $0x384] ss:$8 sps:$4 sm:$0xff]  }
 0x124   : > { %3291 = vmatprep.subr.bf16.mxu0 %v4631_v45  ;;  %v4691_v45 = vld [vmem:[#allocation5 + $0x984] ss:$8 sps:$4 sm:$0xff]  }
 0x126   : > { %2854 = vmatpush1.bf16.msra.mxu1 %v4626_v46  ;;  %v4686_v46 = vld [vmem:[#allocation5 + $0x380] ss:$8 sps:$4 sm:$0xff]  }
 0x127   : > { %3292 = vmatpush1.bf16.msra.mxu0 %v4629_v47  ;;  %2855 = vmatprep.subr.bf16.mxu1 %v4634_v48  ;;  %v4689_v47 = vld [vmem:[#allocation5 + $0x980] ss:$8 sps:$4 sm:$0xff]   ;;  %v4694_v48 = vld [vmem:[#allocation5 + $0x394] ss:$8 sps:$4 sm:$0xff]  }
 0x128   : > { %3293 = vmatprep.subr.bf16.mxu0 %v4637_v49  ;;  %v4697_v49 = vld [vmem:[#allocation5 + $0x994] ss:$8 sps:$4 sm:$0xff]  }
 0x12a   : > { %2856 = vmatpush1.bf16.msra.mxu1 %v4632_v50  ;;  %v4692_v50 = vld [vmem:[#allocation5 + $0x390] ss:$8 sps:$4 sm:$0xff]  }
 0x12b   : > { %3294 = vmatpush1.bf16.msra.mxu0 %v4635_v51  ;;  %2898 = vmatprep.subr.bf16.mxu1 %v4640_v52  ;;  %v4695_v51 = vld [vmem:[#allocation5 + $0x990] ss:$8 sps:$4 sm:$0xff]   ;;  %v4700_v52 = vld [vmem:[#allocation5 + $0x3a4] ss:$8 sps:$4 sm:$0xff]  }
 0x12c   : > { %3336 = vmatprep.subr.bf16.mxu0 %v4643_v55  ;;  %v4701_v55 = vld [vmem:[#allocation5 + $0x9a0] ss:$8 sps:$4 sm:$0xff]  }
 0x12d   : > { %2858 = vmatmul.mubr.bf16.vlgmr.msra.gmra.mrb[0].mxu1 %v271_v58  ;;  %v4704_v58 = vld [vmem:[#allocation5 + $0x3b0] ss:$8 sps:$4 sm:$0xff]  }
 0x12e   : > { %3296 = vmatmul.mubr.bf16.vlgmr.msra.gmra.mrb[0].mxu0 %v283_v59  ;;  %2899 = vmatpush1.bf16.msra.mxu1 %v4638_v56  ;;  %v4706_v56 = vld [vmem:[#allocation5 + $0x3b4] ss:$8 sps:$4 sm:$0xff]   ;;  %v4707_v59 = vld [vmem:[#allocation5 + $0x9b0] ss:$8 sps:$4 sm:$0xff]  }
 0x12f   : > { %3337 = vmatpush1.bf16.msra.mxu0 %v4641_v57  ;;  %2900 = vmatprep.subr.bf16.mxu1 %v4646_v60  ;;  %v4709_v57 = vld [vmem:[#allocation5 + $0x9b4] ss:$8 sps:$4 sm:$0xff]   ;;  %v4712_v60 = vld [vmem:[#allocation5 + $0x3c4] ss:$8 sps:$4 sm:$0xff]  }
 0x130   : > { %3338 = vmatprep.subr.bf16.mxu0 %v4649_v61  ;;  %2867 = vmatprep.mubr.bf16.mxu1 %v296_v62  ;;  %v4715_v61 = vld [vmem:[#allocation5 + $0x9c4] ss:$8 sps:$4 sm:$0xff]   ;;  %v4710_v62 = vld [vmem:[#allocation5 + $0x3c0] ss:$8 sps:$4 sm:$0xff]  }
 0x131   : > { %3305 = vmatprep.mubr.bf16.mxu0 %v308_v63  ;;  %v4713_v63 = vld [vmem:[#allocation5 + $0x9c0] ss:$8 sps:$4 sm:$0xff]  }
 0x132   : > { %2901 = vmatpush1.bf16.msra.mxu1 %v4644_v0  ;;  %v4718_v0 = vld [vmem:[#allocation5 + $0x3d4] ss:$8 sps:$4 sm:$0xff]  }
 0x133   : > { %3339 = vmatpush1.bf16.msra.mxu0 %v4647_v1  ;;  %2902 = vmatprep.subr.bf16.mxu1 %v4652_v2  ;;  %v4721_v1 = vld [vmem:[#allocation5 + $0x9d4] ss:$8 sps:$4 sm:$0xff]   ;;  %v4716_v2 = vld [vmem:[#allocation5 + $0x3d0] ss:$8 sps:$4 sm:$0xff]  }
 0x134   : > { %3340 = vmatprep.subr.bf16.mxu0 %v4655_v3  ;;  %v4719_v3 = vld [vmem:[#allocation5 + $0x9d0] ss:$8 sps:$4 sm:$0xff]  }
 0x135   : > { %2868 = vmatmul.mubr.bf16.gmra.mrb[4].mxu1 %v295_v6  ;;  %v4722_v6 = vld [vmem:[#allocation5 + $0x3e0] ss:$8 sps:$4 sm:$0xff]  }
 0x136   : > { %3306 = vmatmul.mubr.bf16.gmra.mrb[4].mxu0 %v307_v7  ;;  %2903 = vmatpush1.bf16.msra.mxu1 %v4650_v4  ;;  %v4724_v4 = vld [vmem:[#allocation5 + $0x3e4] ss:$8 sps:$4 sm:$0xff]   ;;  %v4725_v7 = vld [vmem:[#allocation5 + $0x9e0] ss:$8 sps:$4 sm:$0xff]  }
 0x137   : > { %3341 = vmatpush1.bf16.msra.mxu0 %v4653_v5  ;;  %2904 = vmatprep.subr.bf16.mxu1 %v4658_v10  ;;  %v4727_v5 = vld [vmem:[#allocation5 + $0x9e4] ss:$8 sps:$4 sm:$0xff]   ;;  %v4728_v10 = vld [vmem:[#allocation5 + $0x3f0] ss:$8 sps:$4 sm:$0xff]  }
 0x138   : > { %3342 = vmatprep.subr.bf16.mxu0 %v4661_v11  ;;  %2877 = vmatprep.mubr.bf16.mxu1 %v320_v14  ;;  %v4731_v11 = vld [vmem:[#allocation5 + $0x9f0] ss:$8 sps:$4 sm:$0xff]  }
 0x139   : > { %3315 = vmatprep.mubr.bf16.mxu0 %v332_v15  ;;  %v237_v14 = vld [vmem:[%s5282_s30 + $0x90] sm:$0xff]  ;;  %v4739_v15 = vld [vmem:[#allocation5 + $0xa04] ss:$8 sps:$4 sm:$0xff]  }
 0x13a   : > { %2905 = vmatpush1.bf16.msra.mxu1 %v4656_v12  ;;  %v4736_v12 = vld [vmem:[#allocation5 + $0x404] ss:$8 sps:$4 sm:$0xff]   ;;  %v285_v18 = vunpack.c.l.u8.bf16 %v237_v14 }
 0x13b   : > { %3343 = vmatpush1.bf16.msra.mxu0 %v4659_v13  ;;  %2906 = vmatprep.subr.bf16.mxu1 %v4664_v16  ;;  %v225_v13 = vld [vmem:[%s5282_s30 + $0x30] sm:$0xff]  ;;  %v4734_v16 = vld [vmem:[#allocation5 + $0x400] ss:$8 sps:$4 sm:$0xff]  }
 0x13c   : > { %3344 = vmatprep.subr.bf16.mxu0 %v4667_v19  ;;  %v273_v17 = vunpack.c.l.u8.bf16 %v225_v13  ;;  %v4737_v19 = vld [vmem:[#allocation5 + $0xa00] ss:$8 sps:$4 sm:$0xff]  }
 0x13d   : > { %2878 = vmatmul.mubr.bf16.gmra.mrb[8].mxu1 %v319_v22  ;;  %v298_v22 = vunpack.c.h.u8.bf16 %v5341_v36  ;;  %v4752_v36 = vld [vmem:[#allocation5 + $0x430] ss:$8 sps:$4 sm:$0xff]  }
 0x13e   : > { %3316 = vmatmul.mubr.bf16.gmra.mrb[8].mxu0 %v331_v23  ;;  %2907 = vmatpush1.bf16.msra.mxu1 %v4662_v20  ;;  %v4742_v20 = vld [vmem:[#allocation5 + $0x414] ss:$8 sps:$4 sm:$0xff]   ;;  %v310_v23 = vunpack.c.h.u8.bf16 %v5344_v37 }
 0x13f   : > { %3345 = vmatpush1.bf16.msra.mxu0 %v4665_v21  ;;  %2908 = vmatprep.subr.bf16.mxu1 %v4670_v24  ;;  %v4745_v21 = vld [vmem:[#allocation5 + $0xa14] ss:$8 sps:$4 sm:$0xff]   ;;  %v4740_v24 = vld [vmem:[#allocation5 + $0x410] ss:$8 sps:$4 sm:$0xff]  }
 0x140   : > { %3346 = vmatprep.subr.bf16.mxu0 %v4673_v25  ;;  %2887 = vmatprep.mubr.bf16.mxu1 %v344_v26  ;;  %v4743_v25 = vld [vmem:[#allocation5 + $0xa10] ss:$8 sps:$4 sm:$0xff]   ;;  %v4748_v26 = vld [vmem:[#allocation5 + $0x424] ss:$8 sps:$4 sm:$0xff]  }
 0x141   : > { %3325 = vmatprep.mubr.bf16.mxu0 %v356_v27  ;;  %v4751_v27 = vld [vmem:[#allocation5 + $0xa24] ss:$8 sps:$4 sm:$0xff]  }
 0x142   : > { %2909 = vmatpush1.bf16.msra.mxu1 %v4668_v28  ;;  %v4746_v28 = vld [vmem:[#allocation5 + $0x420] ss:$8 sps:$4 sm:$0xff]  }
 0x143   : > { %3347 = vmatpush1.bf16.msra.mxu0 %v4671_v29  ;;  %2910 = vmatprep.subr.bf16.mxu1 %v4676_v30  ;;  %v4749_v29 = vld [vmem:[#allocation5 + $0xa20] ss:$8 sps:$4 sm:$0xff]   ;;  %v297_v30 = vunpack.c.h.u8.bf16 %v225_v13  ;;  %v4799_v13 = vld [vmem:[#allocation5 + $0xaa4] ss:$8 sps:$4 sm:$0xff]  }
 0x144   : > { %3348 = vmatprep.subr.bf16.mxu0 %v4679_v31  ;;  %v309_v31 = vunpack.c.h.u8.bf16 %v237_v14  ;;  %v4794_v14 = vld [vmem:[#allocation5 + $0x4a0] ss:$8 sps:$4 sm:$0xff]  }
 0x145   : > { %2888 = vmatmul.mubr.bf16.gmra.mrb[12].mxu1 %v343_v34  ;;  %v4754_v34 = vld [vmem:[#allocation5 + $0x434] ss:$8 sps:$4 sm:$0xff]  }
 0x146   : > { %3326 = vmatmul.mubr.bf16.gmra.mrb[12].mxu0 %v355_v35  ;;  %2911 = vmatpush1.bf16.msra.mxu1 %v4674_v32  ;;  %v250_v32 = vld [vmem:[%s5282_s30 + $0xf8] sm:$0xff] }
 0x147   : > { %3349 = vmatpush1.bf16.msra.mxu0 %v4677_v33  ;;  %2912 = vmatprep.subr.bf16.mxu1 %v4682_v38  ;;  %v262_v33 = vld [vmem:[%s5282_s30 + $0x158] sm:$0xff]  ;;  %v322_v37 = vunpack.c.l.u8.bf16 %v250_v32 }
 0x148   : > { %3350 = vmatprep.subr.bf16.mxu0 %v4685_v39  ;;  %2930 = vmatprep.mubr.bf16.mxu1 %v274_v40  ;;  %v4757_v35 = vld [vmem:[#allocation5 + $0xa34] ss:$8 sps:$4 sm:$0xff]   ;;  %v334_v38 = vunpack.c.l.u8.bf16 %v262_v33  ;;  %v4755_v39 = vld [vmem:[#allocation5 + $0xa30] ss:$8 sps:$4 sm:$0xff]  }
 0x149   : > { %3368 = vmatprep.mubr.bf16.mxu0 %v286_v41  ;;  %v249_v40 = vld [vmem:[%s5282_s30 + $0xf0] sm:$0xff] }
 0x14a   : > { %2913 = vmatpush1.bf16.msra.mxu1 %v4680_v42  ;;  %v261_v41 = vld [vmem:[%s5282_s30 + $0x150] sm:$0xff]  ;;  %v4760_v42 = vld [vmem:[#allocation5 + $0x444] ss:$8 sps:$4 sm:$0xff]  }
 0x14b   : > { %3351 = vmatpush1.bf16.msra.mxu0 %v4683_v43  ;;  %2914 = vmatprep.subr.bf16.mxu1 %v4688_v44  ;;  %v4763_v43 = vld [vmem:[#allocation5 + $0xa44] ss:$8 sps:$4 sm:$0xff]   ;;  %v321_v44 = vunpack.c.l.u8.bf16 %v249_v40 }
 0x14c   : > { %3352 = vmatprep.subr.bf16.mxu0 %v4691_v45  ;;  %v333_v45 = vunpack.c.l.u8.bf16 %v261_v41 }
 0x14e   : > { %2915 = vmatpush1.bf16.msra.mxu1 %v4686_v46  ;;  %v4758_v46 = vld [vmem:[#allocation5 + $0x440] ss:$8 sps:$4 sm:$0xff]  }
 0x14f   : > { %3353 = vmatpush1.bf16.msra.mxu0 %v4689_v47  ;;  %2916 = vmatprep.subr.bf16.mxu1 %v4694_v48  ;;  %v4761_v47 = vld [vmem:[#allocation5 + $0xa40] ss:$8 sps:$4 sm:$0xff]   ;;  %v4766_v48 = vld [vmem:[#allocation5 + $0x454] ss:$8 sps:$4 sm:$0xff]  }
 0x150   : > { %3354 = vmatprep.subr.bf16.mxu0 %v4697_v49  ;;  %v4769_v49 = vld [vmem:[#allocation5 + $0xa54] ss:$8 sps:$4 sm:$0xff]  }
 0x152   : > { %2917 = vmatpush1.bf16.msra.mxu1 %v4692_v50  ;;  %v346_v50 = vunpack.c.h.u8.bf16 %v250_v32  ;;  %v4826_v32 = vld [vmem:[#allocation5 + $0x4f4] ss:$8 sps:$4 sm:$0xff]  }
 0x153   : > { %3355 = vmatpush1.bf16.msra.mxu0 %v4695_v51  ;;  %2918 = vmatprep.subr.bf16.mxu1 %v4700_v52  ;;  %v358_v51 = vunpack.c.h.u8.bf16 %v262_v33  ;;  %v4764_v52 = vld [vmem:[#allocation5 + $0x450] ss:$8 sps:$4 sm:$0xff]   ;;  %v4829_v33 = vld [vmem:[#allocation5 + $0xaf4] ss:$8 sps:$4 sm:$0xff]  }
 0x154   : > { %3356 = vmatprep.subr.bf16.mxu0 %v4703_v53  ;;  %v4767_v53 = vld [vmem:[#allocation5 + $0xa50] ss:$8 sps:$4 sm:$0xff]  }
 0x156   : > { %2919 = vmatpush1.bf16.msra.mxu1 %v4698_v54  ;;  %v4772_v54 = vld [vmem:[#allocation5 + $0x464] ss:$8 sps:$4 sm:$0xff]  }
 0x157   : > { %3357 = vmatpush1.bf16.msra.mxu0 %v4701_v55  ;;  %2920 = vmatprep.subr.bf16.mxu1 %v4706_v56  ;;  %v4775_v55 = vld [vmem:[#allocation5 + $0xa64] ss:$8 sps:$4 sm:$0xff]   ;;  %v345_v56 = vunpack.c.h.u8.bf16 %v249_v40 }
 0x158   : > { %3358 = vmatprep.subr.bf16.mxu0 %v4709_v57  ;;  %v357_v57 = vunpack.c.h.u8.bf16 %v261_v41 }
 0x15a   : > { %2921 = vmatpush1.bf16.msra.mxu1 %v4704_v58  ;;  %v5357_v58 = vld [vmem:[%s5282_s30 + $0x48] sm:$0xff] }
 0x15b   : > { %3359 = vmatpush1.bf16.msra.mxu0 %v4707_v59  ;;  %2922 = vmatprep.subr.bf16.mxu1 %v4712_v60  ;;  %v5360_v59 = vld [vmem:[%s5282_s30 + $0xa8] sm:$0xff] }
 0x15c   : > { %3360 = vmatprep.subr.bf16.mxu0 %v4715_v61  ;;  %v4770_v60 = vld [vmem:[#allocation5 + $0x460] ss:$8 sps:$4 sm:$0xff]  }
 0x15d   : > { %v4773_v61 = vld [vmem:[#allocation5 + $0xa60] ss:$8 sps:$4 sm:$0xff]  }
 0x15e   : > { %2923 = vmatpush1.bf16.msra.mxu1 %v4710_v62  ;;  %v4778_v62 = vld [vmem:[#allocation5 + $0x474] ss:$8 sps:$4 sm:$0xff]  }
 0x15f   : > { %3361 = vmatpush1.bf16.msra.mxu0 %v4713_v63  ;;  %2924 = vmatprep.subr.bf16.mxu1 %v4718_v0  ;;  %v4781_v63 = vld [vmem:[#allocation5 + $0xa74] ss:$8 sps:$4 sm:$0xff]   ;;  %v276_v0 = vunpack.c.l.u8.bf16 %v5357_v58 }
 0x160   : > { %3362 = vmatprep.subr.bf16.mxu0 %v4721_v1  ;;  %v288_v1 = vunpack.c.l.u8.bf16 %v5360_v59 }
 0x162   : > { %2925 = vmatpush1.bf16.msra.mxu1 %v4716_v2  ;;  %v4776_v2 = vld [vmem:[#allocation5 + $0x470] ss:$8 sps:$4 sm:$0xff]  }
 0x163   : > { %3363 = vmatpush1.bf16.msra.mxu0 %v4719_v3  ;;  %2926 = vmatprep.subr.bf16.mxu1 %v4724_v4  ;;  %v4779_v3 = vld [vmem:[#allocation5 + $0xa70] ss:$8 sps:$4 sm:$0xff]   ;;  %v4784_v4 = vld [vmem:[#allocation5 + $0x484] ss:$8 sps:$4 sm:$0xff]  }
 0x164   : > { %3364 = vmatprep.subr.bf16.mxu0 %v4727_v5  ;;  %v4787_v5 = vld [vmem:[#allocation5 + $0xa84] ss:$8 sps:$4 sm:$0xff]  }
 0x166   : > { %2927 = vmatpush1.bf16.msra.mxu1 %v4722_v6  ;;  %v4782_v6 = vld [vmem:[#allocation5 + $0x480] ss:$8 sps:$4 sm:$0xff]  }
 0x167   : > { %3365 = vmatpush1.bf16.msra.mxu0 %v4725_v7  ;;  %2928 = vmatprep.subr.bf16.mxu1 %v4730_v8  ;;  %v4785_v7 = vld [vmem:[#allocation5 + $0xa80] ss:$8 sps:$4 sm:$0xff]   ;;  %v4790_v8 = vld [vmem:[#allocation5 + $0x494] ss:$8 sps:$4 sm:$0xff]  }
 0x168   : > { %3366 = vmatprep.subr.bf16.mxu0 %v4733_v9  ;;  %v4793_v9 = vld [vmem:[#allocation5 + $0xa94] ss:$8 sps:$4 sm:$0xff]  }
 0x16a   : > { %2929 = vmatpush1.bf16.msra.mxu1 %v4728_v10  ;;  %v4788_v10 = vld [vmem:[#allocation5 + $0x490] ss:$8 sps:$4 sm:$0xff]  }
 0x16b   : > { %3367 = vmatpush1.bf16.msra.mxu0 %v4731_v11  ;;  %2971 = vmatprep.subr.bf16.mxu1 %v4736_v12  ;;  %v4791_v11 = vld [vmem:[#allocation5 + $0xa90] ss:$8 sps:$4 sm:$0xff]   ;;  %v4796_v12 = vld [vmem:[#allocation5 + $0x4a4] ss:$8 sps:$4 sm:$0xff]  }
 0x16c   : > { %3409 = vmatprep.subr.bf16.mxu0 %v4739_v15  ;;  %v4797_v15 = vld [vmem:[#allocation5 + $0xaa0] ss:$8 sps:$4 sm:$0xff]  }
 0x16d   : > { %2931 = vmatmul.mubr.bf16.vlgmr.msra.gmra.mrb[0].mxu1 %v273_v17  ;;  %v4805_v17 = vld [vmem:[#allocation5 + $0xab4] ss:$8 sps:$4 sm:$0xff]  }
 0x16e   : > { %3369 = vmatmul.mubr.bf16.vlgmr.msra.gmra.mrb[0].mxu0 %v285_v18  ;;  %2972 = vmatpush1.bf16.msra.mxu1 %v4734_v16  ;;  %v4802_v16 = vld [vmem:[#allocation5 + $0x4b4] ss:$8 sps:$4 sm:$0xff]   ;;  %v4800_v18 = vld [vmem:[#allocation5 + $0x4b0] ss:$8 sps:$4 sm:$0xff]  }
 0x16f   : > { %3410 = vmatpush1.bf16.msra.mxu0 %v4737_v19  ;;  %2973 = vmatprep.subr.bf16.mxu1 %v4742_v20  ;;  %v4803_v19 = vld [vmem:[#allocation5 + $0xab0] ss:$8 sps:$4 sm:$0xff]   ;;  %v4808_v20 = vld [vmem:[#allocation5 + $0x4c4] ss:$8 sps:$4 sm:$0xff]  }
 0x170   : > { %3411 = vmatprep.subr.bf16.mxu0 %v4745_v21  ;;  %2940 = vmatprep.mubr.bf16.mxu1 %v298_v22  ;;  %v4811_v21 = vld [vmem:[#allocation5 + $0xac4] ss:$8 sps:$4 sm:$0xff]   ;;  %v4806_v22 = vld [vmem:[#allocation5 + $0x4c0] ss:$8 sps:$4 sm:$0xff]  }
 0x171   : > { %3378 = vmatprep.mubr.bf16.mxu0 %v310_v23  ;;  %v4809_v23 = vld [vmem:[#allocation5 + $0xac0] ss:$8 sps:$4 sm:$0xff]  }
 0x172   : > { %2974 = vmatpush1.bf16.msra.mxu1 %v4740_v24  ;;  %v4814_v24 = vld [vmem:[#allocation5 + $0x4d4] ss:$8 sps:$4 sm:$0xff]  }
 0x173   : > { %3412 = vmatpush1.bf16.msra.mxu0 %v4743_v25  ;;  %2975 = vmatprep.subr.bf16.mxu1 %v4748_v26  ;;  %v4817_v25 = vld [vmem:[#allocation5 + $0xad4] ss:$8 sps:$4 sm:$0xff]   ;;  %v4812_v26 = vld [vmem:[#allocation5 + $0x4d0] ss:$8 sps:$4 sm:$0xff]  }
 0x174   : > { %3413 = vmatprep.subr.bf16.mxu0 %v4751_v27  ;;  %v4815_v27 = vld [vmem:[#allocation5 + $0xad0] ss:$8 sps:$4 sm:$0xff]  }
 0x175   : > { %2941 = vmatmul.mubr.bf16.gmra.mrb[4].mxu1 %v297_v30  ;;  %v4818_v30 = vld [vmem:[#allocation5 + $0x4e0] ss:$8 sps:$4 sm:$0xff]  }
 0x176   : > { %3379 = vmatmul.mubr.bf16.gmra.mrb[4].mxu0 %v309_v31  ;;  %2976 = vmatpush1.bf16.msra.mxu1 %v4746_v28  ;;  %v4820_v28 = vld [vmem:[#allocation5 + $0x4e4] ss:$8 sps:$4 sm:$0xff]   ;;  %v4821_v31 = vld [vmem:[#allocation5 + $0xae0] ss:$8 sps:$4 sm:$0xff]  }
 0x177   : > { %3414 = vmatpush1.bf16.msra.mxu0 %v4749_v29  ;;  %2977 = vmatprep.subr.bf16.mxu1 %v4754_v34  ;;  %v4823_v29 = vld [vmem:[#allocation5 + $0xae4] ss:$8 sps:$4 sm:$0xff]   ;;  %v4824_v34 = vld [vmem:[#allocation5 + $0x4f0] ss:$8 sps:$4 sm:$0xff]  }
 0x178   : > { %3415 = vmatprep.subr.bf16.mxu0 %v4757_v35  ;;  %2950 = vmatprep.mubr.bf16.mxu1 %v322_v37  ;;  %v4827_v35 = vld [vmem:[#allocation5 + $0xaf0] ss:$8 sps:$4 sm:$0xff]   ;;  %v239_v37 = vld [vmem:[%s5282_s30 + $0xa0] sm:$0xff] }
 0x179   : > { %3388 = vmatprep.mubr.bf16.mxu0 %v334_v38  ;;  %v4832_v38 = vld [vmem:[#allocation5 + $0x504] ss:$8 sps:$4 sm:$0xff]   ;;  %v287_v41 = vunpack.c.l.u8.bf16 %v239_v37 }
 0x17a   : > { %2978 = vmatpush1.bf16.msra.mxu1 %v4752_v36  ;;  %v227_v36 = vld [vmem:[%s5282_s30 + $0x40] sm:$0xff] }
 0x17b   : > { %3416 = vmatpush1.bf16.msra.mxu0 %v4755_v39  ;;  %2979 = vmatprep.subr.bf16.mxu1 %v4760_v42  ;;  %v4835_v39 = vld [vmem:[#allocation5 + $0xb04] ss:$8 sps:$4 sm:$0xff]   ;;  %v275_v40 = vunpack.c.l.u8.bf16 %v227_v36  ;;  %v4830_v42 = vld [vmem:[#allocation5 + $0x500] ss:$8 sps:$4 sm:$0xff]  }
 0x17c   : > { %3417 = vmatprep.subr.bf16.mxu0 %v4763_v43  ;;  %v4833_v43 = vld [vmem:[#allocation5 + $0xb00] ss:$8 sps:$4 sm:$0xff]  }
 0x17d   : > { %2951 = vmatmul.mubr.bf16.gmra.mrb[8].mxu1 %v321_v44  ;;  %v4838_v44 = vld [vmem:[#allocation5 + $0x514] ss:$8 sps:$4 sm:$0xff]  }
 0x17e   : > { %3389 = vmatmul.mubr.bf16.gmra.mrb[8].mxu0 %v333_v45  ;;  %2980 = vmatpush1.bf16.msra.mxu1 %v4758_v46  ;;  %v4841_v45 = vld [vmem:[#allocation5 + $0xb14] ss:$8 sps:$4 sm:$0xff]   ;;  %v300_v46 = vunpack.c.h.u8.bf16 %v5357_v58 }
 0x17f   : > { %3418 = vmatpush1.bf16.msra.mxu0 %v4761_v47  ;;  %2981 = vmatprep.subr.bf16.mxu1 %v4766_v48  ;;  %v312_v47 = vunpack.c.h.u8.bf16 %v5360_v59  ;;  %v4836_v48 = vld [vmem:[#allocation5 + $0x510] ss:$8 sps:$4 sm:$0xff]   ;;  %v4850_v58 = vld [vmem:[#allocation5 + $0x534] ss:$8 sps:$4 sm:$0xff]  }
 0x180   : > { %3419 = vmatprep.subr.bf16.mxu0 %v4769_v49  ;;  %2960 = vmatprep.mubr.bf16.mxu1 %v346_v50  ;;  %v4839_v49 = vld [vmem:[#allocation5 + $0xb10] ss:$8 sps:$4 sm:$0xff]   ;;  %v4844_v50 = vld [vmem:[#allocation5 + $0x524] ss:$8 sps:$4 sm:$0xff]   ;;  %v4853_v59 = vld [vmem:[#allocation5 + $0xb34] ss:$8 sps:$4 sm:$0xff]  }
 0x181   : > { %3398 = vmatprep.mubr.bf16.mxu0 %v358_v51  ;;  %v4847_v51 = vld [vmem:[#allocation5 + $0xb24] ss:$8 sps:$4 sm:$0xff]  }
 0x182   : > { %2982 = vmatpush1.bf16.msra.mxu1 %v4764_v52  ;;  %v299_v52 = vunpack.c.h.u8.bf16 %v227_v36  ;;  %v4892_v36 = vld [vmem:[#allocation5 + $0x5a4] ss:$8 sps:$4 sm:$0xff]  }
 0x183   : > { %3420 = vmatpush1.bf16.msra.mxu0 %v4767_v53  ;;  %2983 = vmatprep.subr.bf16.mxu1 %v4772_v54  ;;  %v311_v53 = vunpack.c.h.u8.bf16 %v239_v37  ;;  %v252_v54 = vld [vmem:[%s5282_s30 + $0x108] sm:$0xff] }
 0x184   : > { %3421 = vmatprep.subr.bf16.mxu0 %v4775_v55  ;;  %v264_v55 = vld [vmem:[%s5282_s30 + $0x168] sm:$0xff] }
 0x185   : > { %2961 = vmatmul.mubr.bf16.gmra.mrb[12].mxu1 %v345_v56  ;;  %v4842_v56 = vld [vmem:[#allocation5 + $0x520] ss:$8 sps:$4 sm:$0xff]   ;;  %v4895_v37 = vld [vmem:[#allocation5 + $0xba4] ss:$8 sps:$4 sm:$0xff]  }
 0x186   : > { %3399 = vmatmul.mubr.bf16.gmra.mrb[12].mxu0 %v357_v57  ;;  %2984 = vmatpush1.bf16.msra.mxu1 %v4770_v60  ;;  %v4845_v57 = vld [vmem:[#allocation5 + $0xb20] ss:$8 sps:$4 sm:$0xff]   ;;  %v324_v60 = vunpack.c.l.u8.bf16 %v252_v54 }
 0x187   : > { %3422 = vmatpush1.bf16.msra.mxu0 %v4773_v61  ;;  %2985 = vmatprep.subr.bf16.mxu1 %v4778_v62  ;;  %v336_v61 = vunpack.c.l.u8.bf16 %v264_v55  ;;  %v4848_v62 = vld [vmem:[#allocation5 + $0x530] ss:$8 sps:$4 sm:$0xff]  }
 0x188   : > { %3423 = vmatprep.subr.bf16.mxu0 %v4781_v63  ;;  %3003 = vmatprep.mubr.bf16.mxu1 %v276_v0  ;;  %v4851_v63 = vld [vmem:[#allocation5 + $0xb30] ss:$8 sps:$4 sm:$0xff]   ;;  %v251_v0 = vld [vmem:[%s5282_s30 + $0x100] sm:$0xff] }
 0x189   : > { %3441 = vmatprep.mubr.bf16.mxu0 %v288_v1  ;;  %v263_v1 = vld [vmem:[%s5282_s30 + $0x160] sm:$0xff] }
 0x18a   : > { %2986 = vmatpush1.bf16.msra.mxu1 %v4776_v2  ;;  %v4856_v2 = vld [vmem:[#allocation5 + $0x544] ss:$8 sps:$4 sm:$0xff]  }
 0x18b   : > { %3424 = vmatpush1.bf16.msra.mxu0 %v4779_v3  ;;  %2987 = vmatprep.subr.bf16.mxu1 %v4784_v4  ;;  %v4859_v3 = vld [vmem:[#allocation5 + $0xb44] ss:$8 sps:$4 sm:$0xff]   ;;  %v323_v4 = vunpack.c.l.u8.bf16 %v251_v0 }
 0x18c   : > { %3425 = vmatprep.subr.bf16.mxu0 %v4787_v5  ;;  %v335_v5 = vunpack.c.l.u8.bf16 %v263_v1 }
 0x18e   : > { %2988 = vmatpush1.bf16.msra.mxu1 %v4782_v6  ;;  %v4854_v6 = vld [vmem:[#allocation5 + $0x540] ss:$8 sps:$4 sm:$0xff]  }
 0x18f   : > { %3426 = vmatpush1.bf16.msra.mxu0 %v4785_v7  ;;  %2989 = vmatprep.subr.bf16.mxu1 %v4790_v8  ;;  %v4857_v7 = vld [vmem:[#allocation5 + $0xb40] ss:$8 sps:$4 sm:$0xff]   ;;  %v4862_v8 = vld [vmem:[#allocation5 + $0x554] ss:$8 sps:$4 sm:$0xff]  }
 0x190   : > { %3427 = vmatprep.subr.bf16.mxu0 %v4793_v9  ;;  %v4865_v9 = vld [vmem:[#allocation5 + $0xb54] ss:$8 sps:$4 sm:$0xff]  }
 0x192   : > { %2990 = vmatpush1.bf16.msra.mxu1 %v4788_v10  ;;  %v348_v10 = vunpack.c.h.u8.bf16 %v252_v54  ;;  %v4914_v54 = vld [vmem:[#allocation5 + $0x5e0] ss:$8 sps:$4 sm:$0xff]  }
 0x193   : > { %3428 = vmatpush1.bf16.msra.mxu0 %v4791_v11  ;;  %2991 = vmatprep.subr.bf16.mxu1 %v4796_v12  ;;  %v360_v11 = vunpack.c.h.u8.bf16 %v264_v55  ;;  %v4860_v12 = vld [vmem:[#allocation5 + $0x550] ss:$8 sps:$4 sm:$0xff]   ;;  %v4917_v55 = vld [vmem:[#allocation5 + $0xbe0] ss:$8 sps:$4 sm:$0xff]  }
 0x194   : > { %3429 = vmatprep.subr.bf16.mxu0 %v4799_v13  ;;  %v4863_v13 = vld [vmem:[#allocation5 + $0xb50] ss:$8 sps:$4 sm:$0xff]  }
 0x196   : > { %2992 = vmatpush1.bf16.msra.mxu1 %v4794_v14  ;;  %v4868_v14 = vld [vmem:[#allocation5 + $0x564] ss:$8 sps:$4 sm:$0xff]  }
 0x197   : > { %3430 = vmatpush1.bf16.msra.mxu0 %v4797_v15  ;;  %2993 = vmatprep.subr.bf16.mxu1 %v4802_v16  ;;  %v4871_v15 = vld [vmem:[#allocation5 + $0xb64] ss:$8 sps:$4 sm:$0xff]   ;;  %v347_v16 = vunpack.c.h.u8.bf16 %v251_v0 }
 0x198   : > { %3431 = vmatprep.subr.bf16.mxu0 %v4805_v17  ;;  %v359_v17 = vunpack.c.h.u8.bf16 %v263_v1 }
 0x19a   : > { %2994 = vmatpush1.bf16.msra.mxu1 %v4800_v18  ;;  %v5373_v18 = vld [vmem:[%s5282_s30 + $0x58] sm:$0xff] }
 0x19b   : > { %3432 = vmatpush1.bf16.msra.mxu0 %v4803_v19  ;;  %2995 = vmatprep.subr.bf16.mxu1 %v4808_v20  ;;  %v5376_v19 = vld [vmem:[%s5282_s30 + $0xb8] sm:$0xff]  ;;  %v4866_v20 = vld [vmem:[#allocation5 + $0x560] ss:$8 sps:$4 sm:$0xff]   ;;  %v302_v0 = vunpack.c.h.u8.bf16 %v5373_v18 }
 0x19c   : > { %3433 = vmatprep.subr.bf16.mxu0 %v4811_v21  ;;  %v4869_v21 = vld [vmem:[#allocation5 + $0xb60] ss:$8 sps:$4 sm:$0xff]   ;;  %v314_v1 = vunpack.c.h.u8.bf16 %v5376_v19 }
 0x19e   : > { %2996 = vmatpush1.bf16.msra.mxu1 %v4806_v22  ;;  %v4874_v22 = vld [vmem:[#allocation5 + $0x574] ss:$8 sps:$4 sm:$0xff]  }
 0x19f   : > { %3434 = vmatpush1.bf16.msra.mxu0 %v4809_v23  ;;  %2997 = vmatprep.subr.bf16.mxu1 %v4814_v24  ;;  %v4877_v23 = vld [vmem:[#allocation5 + $0xb74] ss:$8 sps:$4 sm:$0xff]   ;;  %v278_v24 = vunpack.c.l.u8.bf16 %v5373_v18 }
 0x1a0   : > { %3435 = vmatprep.subr.bf16.mxu0 %v4817_v25  ;;  %v290_v25 = vunpack.c.l.u8.bf16 %v5376_v19  ;;  %v747_v19 = vld [vmem:[#allocation7] sm:$0x3] }
 0x1a2   : > { %2998 = vmatpush1.bf16.msra.mxu1 %v4812_v26  ;;  %v4872_v26 = vld [vmem:[#allocation5 + $0x570] ss:$8 sps:$4 sm:$0xff]  }
 0x1a3   : > { %3436 = vmatpush1.bf16.msra.mxu0 %v4815_v27  ;;  %2999 = vmatprep.subr.bf16.mxu1 %v4820_v28  ;;  %v4875_v27 = vld [vmem:[#allocation5 + $0xb70] ss:$8 sps:$4 sm:$0xff]   ;;  %v4880_v28 = vld [vmem:[#allocation5 + $0x584] ss:$8 sps:$4 sm:$0xff]  }
 0x1a4   : > { %3437 = vmatprep.subr.bf16.mxu0 %v4823_v29  ;;  %v4883_v29 = vld [vmem:[#allocation5 + $0xb84] ss:$8 sps:$4 sm:$0xff]  }
 0x1a6   : > { %3000 = vmatpush1.bf16.msra.mxu1 %v4818_v30  ;;  %v4878_v30 = vld [vmem:[#allocation5 + $0x580] ss:$8 sps:$4 sm:$0xff]  }
 0x1a7   : > { %3438 = vmatpush1.bf16.msra.mxu0 %v4821_v31  ;;  %3001 = vmatprep.subr.bf16.mxu1 %v4826_v32  ;;  %v4881_v31 = vld [vmem:[#allocation5 + $0xb80] ss:$8 sps:$4 sm:$0xff]   ;;  %v4886_v32 = vld [vmem:[#allocation5 + $0x594] ss:$8 sps:$4 sm:$0xff]  }
 0x1a8   : > { %3439 = vmatprep.subr.bf16.mxu0 %v4829_v33  ;;  %v4889_v33 = vld [vmem:[#allocation5 + $0xb94] ss:$8 sps:$4 sm:$0xff]  }
 0x1aa   : > { %3002 = vmatpush1.bf16.msra.mxu1 %v4824_v34  ;;  %v4884_v34 = vld [vmem:[#allocation5 + $0x590] ss:$8 sps:$4 sm:$0xff]  }
 0x1ab   : > { %3440 = vmatpush1.bf16.msra.mxu0 %v4827_v35  ;;  %3044 = vmatprep.subr.bf16.mxu1 %v4832_v38  ;;  %v4887_v35 = vld [vmem:[#allocation5 + $0xb90] ss:$8 sps:$4 sm:$0xff]   ;;  %v4890_v38 = vld [vmem:[#allocation5 + $0x5a0] ss:$8 sps:$4 sm:$0xff]  }
 0x1ac   : > { %3482 = vmatprep.subr.bf16.mxu0 %v4835_v39  ;;  %v4893_v39 = vld [vmem:[#allocation5 + $0xba0] ss:$8 sps:$4 sm:$0xff]  }
 0x1ad   : > { %3004 = vmatmul.mubr.bf16.vlgmr.msra.gmra.mrb[0].mxu1 %v275_v40  ;;  %v4898_v40 = vld [vmem:[#allocation5 + $0x5b4] ss:$8 sps:$4 sm:$0xff]  }
 0x1ae   : > { %3442 = vmatmul.mubr.bf16.vlgmr.msra.gmra.mrb[0].mxu0 %v287_v41  ;;  %3045 = vmatpush1.bf16.msra.mxu1 %v4830_v42  ;;  %v4901_v41 = vld [vmem:[#allocation5 + $0xbb4] ss:$8 sps:$4 sm:$0xff]   ;;  %v4896_v42 = vld [vmem:[#allocation5 + $0x5b0] ss:$8 sps:$4 sm:$0xff]  }
 0x1af   : > { %3483 = vmatpush1.bf16.msra.mxu0 %v4833_v43  ;;  %3046 = vmatprep.subr.bf16.mxu1 %v4838_v44  ;;  %v4899_v43 = vld [vmem:[#allocation5 + $0xbb0] ss:$8 sps:$4 sm:$0xff]   ;;  %v4904_v44 = vld [vmem:[#allocation5 + $0x5c4] ss:$8 sps:$4 sm:$0xff]  }
 0x1b0   : > { %3484 = vmatprep.subr.bf16.mxu0 %v4841_v45  ;;  %3013 = vmatprep.mubr.bf16.mxu1 %v300_v46  ;;  %v4907_v45 = vld [vmem:[#allocation5 + $0xbc4] ss:$8 sps:$4 sm:$0xff]   ;;  %v4902_v46 = vld [vmem:[#allocation5 + $0x5c0] ss:$8 sps:$4 sm:$0xff]  }
 0x1b1   : > { %3451 = vmatprep.mubr.bf16.mxu0 %v312_v47  ;;  %v4905_v47 = vld [vmem:[#allocation5 + $0xbc0] ss:$8 sps:$4 sm:$0xff]  }
 0x1b2   : > { %3047 = vmatpush1.bf16.msra.mxu1 %v4836_v48  ;;  %v4910_v48 = vld [vmem:[#allocation5 + $0x5d4] ss:$8 sps:$4 sm:$0xff]  }
 0x1b3   : > { %3485 = vmatpush1.bf16.msra.mxu0 %v4839_v49  ;;  %3048 = vmatprep.subr.bf16.mxu1 %v4844_v50  ;;  %v4913_v49 = vld [vmem:[#allocation5 + $0xbd4] ss:$8 sps:$4 sm:$0xff]   ;;  %v4908_v50 = vld [vmem:[#allocation5 + $0x5d0] ss:$8 sps:$4 sm:$0xff]  }
 0x1b4   : > { %3486 = vmatprep.subr.bf16.mxu0 %v4847_v51  ;;  %v4911_v51 = vld [vmem:[#allocation5 + $0xbd0] ss:$8 sps:$4 sm:$0xff]  }
 0x1b5   : > { %3014 = vmatmul.mubr.bf16.gmra.mrb[4].mxu1 %v299_v52  ;;  %v4916_v52 = vld [vmem:[#allocation5 + $0x5e4] ss:$8 sps:$4 sm:$0xff]  }
 0x1b6   : > { %3452 = vmatmul.mubr.bf16.gmra.mrb[4].mxu0 %v311_v53  ;;  %3049 = vmatpush1.bf16.msra.mxu1 %v4842_v56  ;;  %v4919_v53 = vld [vmem:[#allocation5 + $0xbe4] ss:$8 sps:$4 sm:$0xff]   ;;  %v4922_v56 = vld [vmem:[#allocation5 + $0x5f4] ss:$8 sps:$4 sm:$0xff]  }
 0x1b7   : > { %3487 = vmatpush1.bf16.msra.mxu0 %v4845_v57  ;;  %3050 = vmatprep.subr.bf16.mxu1 %v4850_v58  ;;  %v4925_v57 = vld [vmem:[#allocation5 + $0xbf4] ss:$8 sps:$4 sm:$0xff]   ;;  %v4920_v58 = vld [vmem:[#allocation5 + $0x5f0] ss:$8 sps:$4 sm:$0xff]  }
 0x1b8   : > { %3488 = vmatprep.subr.bf16.mxu0 %v4853_v59  ;;  %3023 = vmatprep.mubr.bf16.mxu1 %v324_v60  ;;  %v4923_v59 = vld [vmem:[#allocation5 + $0xbf0] ss:$8 sps:$4 sm:$0xff]  }
 0x1b9   : > { %3461 = vmatprep.mubr.bf16.mxu0 %v336_v61  ;;  %v229_v60 = vld [vmem:[%s5282_s30 + $0x50] sm:$0xff] }
 0x1ba   : > { %3051 = vmatpush1.bf16.msra.mxu1 %v4848_v62  ;;  %v241_v61 = vld [vmem:[%s5282_s30 + $0xb0] sm:$0xff]  ;;  %v277_v62 = vunpack.c.l.u8.bf16 %v229_v60 }
 0x1bb   : > { %3489 = vmatpush1.bf16.msra.mxu0 %v4851_v63  ;;  %3052 = vmatprep.subr.bf16.mxu1 %v4856_v2  ;;  %v289_v63 = vunpack.c.l.u8.bf16 %v241_v61  ;;  %v254_v2 = vld [vmem:[%s5282_s30 + $0x118] sm:$0xff] }
 0x1bc   : > { %3490 = vmatprep.subr.bf16.mxu0 %v4859_v3  ;;  %v266_v3 = vld [vmem:[%s5282_s30 + $0x178] sm:$0xff] }
 0x1bd   : > { %3024 = vmatmul.mubr.bf16.gmra.mrb[8].mxu1 %v323_v4  ;;  %v301_v4 = vunpack.c.h.u8.bf16 %v229_v60 }
 0x1be   : > { %3462 = vmatmul.mubr.bf16.gmra.mrb[8].mxu0 %v335_v5  ;;  %3053 = vmatpush1.bf16.msra.mxu1 %v4854_v6  ;;  %v313_v5 = vunpack.c.h.u8.bf16 %v241_v61  ;;  %v326_v6 = vunpack.c.l.u8.bf16 %v254_v2 }
 0x1bf   : > { %3491 = vmatpush1.bf16.msra.mxu0 %v4857_v7  ;;  %3054 = vmatprep.subr.bf16.mxu1 %v4862_v8  ;;  %v338_v7 = vunpack.c.l.u8.bf16 %v266_v3  ;;  %v253_v8 = vld [vmem:[%s5282_s30 + $0x110] sm:$0xff] }
 0x1c0   : > { %3492 = vmatprep.subr.bf16.mxu0 %v4865_v9  ;;  %3033 = vmatprep.mubr.bf16.mxu1 %v348_v10  ;;  %v265_v9 = vld [vmem:[%s5282_s30 + $0x170] sm:$0xff]  ;;  %v325_v10 = vunpack.c.l.u8.bf16 %v253_v8 }
 0x1c1   : > { %3471 = vmatprep.mubr.bf16.mxu0 %v360_v11  ;;  %v337_v11 = vunpack.c.l.u8.bf16 %v265_v9 }
 0x1c2   : > { %3055 = vmatpush1.bf16.msra.mxu1 %v4860_v12  ;;  %v350_v12 = vunpack.c.h.u8.bf16 %v254_v2 }
 0x1c3   : > { %3493 = vmatpush1.bf16.msra.mxu0 %v4863_v13  ;;  %3056 = vmatprep.subr.bf16.mxu1 %v4868_v14  ;;  %v362_v13 = vunpack.c.h.u8.bf16 %v266_v3  ;;  %v349_v14 = vunpack.c.h.u8.bf16 %v253_v8 }
 0x1c4   : > { %3494 = vmatprep.subr.bf16.mxu0 %v4871_v15  ;;  %v361_v15 = vunpack.c.h.u8.bf16 %v265_v9 }
 0x1c5   : > { %3034 = vmatmul.mubr.bf16.gmra.mrb[12].mxu1 %v347_v16  ;;  %v749_v16 = vlaneseq }
 0x1c6   : > { %3472 = vmatmul.mubr.bf16.gmra.mrb[12].mxu0 %v359_v17  ;;  %3057 = vmatpush1.bf16.msra.mxu1 %v4866_v20 }
 0x1c7   : > { %3495 = vmatpush1.bf16.msra.mxu0 %v4869_v21  ;;  %3058 = vmatprep.subr.bf16.mxu1 %v4874_v22  ;;  %v750_v17 = vshrl.u32 %v749_v16, 7 }
 0x1c8   : > { %3496 = vmatprep.subr.bf16.mxu0 %v4877_v23  ;;  %3076 = vmatprep.mubr.bf16.mxu1 %v278_v24 }
 0x1c9   : > { %3514 = vmatprep.mubr.bf16.mxu0 %v290_v25  ;;  %v751_v18 = vsub.s32 0, %v750_v17  ;;  %v755_v20 = vsub.s32 1, %v750_v17 }
 0x1ca   : > { %3059 = vmatpush1.bf16.msra.mxu1 %v4872_v26 }
 0x1cb   : > { %3497 = vmatpush1.bf16.msra.mxu0 %v4875_v27  ;;  %3060 = vmatprep.subr.bf16.mxu1 %v4880_v28  ;;  %v5388_v21 = vrot.slane %v747_v19, %v751_v18  ;;  %v5390_v22 = vrot.slane %v747_v19, %v755_v20 }
 0x1cc   : > { %3498 = vmatprep.subr.bf16.mxu0 %v4883_v29 }
 0x1ce   : > { %3061 = vmatpush1.bf16.msra.mxu1 %v4878_v30 }
 0x1cf   : > { %3499 = vmatpush1.bf16.msra.mxu0 %v4881_v31  ;;  %3062 = vmatprep.subr.bf16.mxu1 %v4886_v32 }
 0x1d0   : > { %3500 = vmatprep.subr.bf16.mxu0 %v4889_v33 }
 0x1d2   : > { %3063 = vmatpush1.bf16.msra.mxu1 %v4884_v34 }
 0x1d3   : > { %3501 = vmatpush1.bf16.msra.mxu0 %v4887_v35  ;;  %3064 = vmatprep.subr.bf16.mxu1 %v4892_v36 }
 0x1d4   : > { %3502 = vmatprep.subr.bf16.mxu0 %v4895_v37 }
 0x1d6   : > { %3065 = vmatpush1.bf16.msra.mxu1 %v4890_v38 }
 0x1d7   : > { %3503 = vmatpush1.bf16.msra.mxu0 %v4893_v39  ;;  %3066 = vmatprep.subr.bf16.mxu1 %v4898_v40 }
 0x1d8   : > { %3504 = vmatprep.subr.bf16.mxu0 %v4901_v41 }
 0x1da   : > { %3067 = vmatpush1.bf16.msra.mxu1 %v4896_v42 }
 0x1db   : > { %3505 = vmatpush1.bf16.msra.mxu0 %v4899_v43  ;;  %3068 = vmatprep.subr.bf16.mxu1 %v4904_v44 }
 0x1dc   : > { %3506 = vmatprep.subr.bf16.mxu0 %v4907_v45 }
 0x1de   : > { %3069 = vmatpush1.bf16.msra.mxu1 %v4902_v46 }
 0x1df   : > { %3507 = vmatpush1.bf16.msra.mxu0 %v4905_v47  ;;  %3070 = vmatprep.subr.bf16.mxu1 %v4910_v48 }
 0x1e0   : > { %3508 = vmatprep.subr.bf16.mxu0 %v4913_v49 }
 0x1e2   : > { %3071 = vmatpush1.bf16.msra.mxu1 %v4908_v50 }
 0x1e3   : > { %3509 = vmatpush1.bf16.msra.mxu0 %v4911_v51  ;;  %3072 = vmatprep.subr.bf16.mxu1 %v4916_v52 }
 0x1e4   : > { %3510 = vmatprep.subr.bf16.mxu0 %v4919_v53 }
 0x1e6   : > { %3073 = vmatpush1.bf16.msra.mxu1 %v4914_v54 }
 0x1e7   : > { %3511 = vmatpush1.bf16.msra.mxu0 %v4917_v55  ;;  %3074 = vmatprep.subr.bf16.mxu1 %v4922_v56 }
 0x1e8   : > { %3512 = vmatprep.subr.bf16.mxu0 %v4925_v57 }
 0x1ea   : > { %3075 = vmatpush1.bf16.msra.mxu1 %v4920_v58 }
 0x1eb   : > { %3513 = vmatpush1.bf16.msra.mxu0 %v4923_v59 }
 0x1ed   : > { %3077 = vmatmul.mubr.bf16.vlgmr.msra.gmra.mrb[0].mxu1 %v277_v62 }
 0x1ee   : > { %3515 = vmatmul.mubr.bf16.vlgmr.msra.gmra.mrb[0].mxu0 %v289_v63  ;;  %3086 = vmatprep.mubr.bf16.mxu1 %v302_v0 }
 0x1ef   : > { %3524 = vmatprep.mubr.bf16.mxu0 %v314_v1 }
 0x1f5   : > { %3087 = vmatmul.mubr.bf16.gmra.mrb[4].mxu1 %v301_v4 }
 0x1f6   : > { %3525 = vmatmul.mubr.bf16.gmra.mrb[4].mxu0 %v313_v5  ;;  %3096 = vmatprep.mubr.bf16.mxu1 %v326_v6 }
 0x1f7   : > { %3534 = vmatprep.mubr.bf16.mxu0 %v338_v7 }
 0x1fd   : > { %3097 = vmatmul.mubr.bf16.gmra.mrb[8].mxu1 %v325_v10 }
 0x1fe   : > { %3535 = vmatmul.mubr.bf16.gmra.mrb[8].mxu0 %v337_v11  ;;  %3106 = vmatprep.mubr.bf16.mxu1 %v350_v12 }
 0x1ff   : > { %3544 = vmatprep.mubr.bf16.mxu0 %v362_v13 }
 0x205   : > { %3107 = vmatmul.mubr.bf16.gmra.mrb[12].mxu1 %v349_v14 }
 0x206   : > { %3545 = vmatmul.mubr.bf16.gmra.mrb[12].mxu0 %v361_v15 }
 0x2c0   : > { %v3078_v23 = vpop.f32.mrb[0].mxu1 }
 0x2c1   : > { %v3516_v24 = vpop.f32.mrb[0].mxu0  ;;  %v4082_v25 = vadd.f32 %v3078_v23, %v5388_v21  ;;  %v3080_v26 = vpop.f32.mrb[1].mxu1 }
 0x2c2   : > { %v3518_v27 = vpop.f32.mrb[1].mxu0  ;;  %v4084_v28 = vadd.f32 %v3080_v26, %v5390_v22  ;;  %v3082_v29 = vpop.f32.mrb[2].mxu1 }
 0x2c3   : > { %v3520_v30 = vpop.f32.mrb[2].mxu0  ;;  %v4083_v31 = vadd.f32 %v4082_v25, %v3516_v24  ;;  %v4086_v32 = vadd.f32 %v3082_v29, %v5388_v21  ;;  %v3084_v33 = vpop.f32.mrb[3].mxu1 }
 0x2c4   : > { %v3522_v34 = vpop.f32.mrb[3].mxu0  ;;  %v4085_v35 = vadd.f32 %v4084_v28, %v3518_v27  ;;  %v4088_v36 = vadd.f32 %v3084_v33, %v5390_v22 }
 0x2c5   : > { %3555 = vst [vmem:[%s5397_s20] sm:$0xff] %v4083_v31  ;;  %v4087_v37 = vadd.f32 %v4086_v32, %v3520_v30 }
 0x2c6   : > { %3556 = vst [vmem:[%s5397_s20 + $0x8] sm:$0xff] %v4085_v35  ;;  %v4089_v38 = vadd.f32 %v4088_v36, %v3522_v34 }
 0x2c7   : > { %3557 = vst [vmem:[%s5397_s20 + $0x10] sm:$0xff] %v4087_v37 }
 0x2c8   : > { %3558 = vst [vmem:[%s5397_s20 + $0x18] sm:$0xff] %v4089_v38  ;;  %v3088_v39 = vpop.f32.mrb[4].mxu1 }
 0x2c9   : > { %v3526_v40 = vpop.f32.mrb[4].mxu0  ;;  %v4090_v41 = vadd.f32 %v3088_v39, %v5388_v21  ;;  %v3090_v42 = vpop.f32.mrb[5].mxu1 }
 0x2ca   : > { %v3528_v43 = vpop.f32.mrb[5].mxu0  ;;  %v4092_v44 = vadd.f32 %v3090_v42, %v5390_v22  ;;  %v3092_v45 = vpop.f32.mrb[6].mxu1 }
 0x2cb   : > { %v3530_v46 = vpop.f32.mrb[6].mxu0  ;;  %v4091_v47 = vadd.f32 %v4090_v41, %v3526_v40  ;;  %v4094_v48 = vadd.f32 %v3092_v45, %v5388_v21  ;;  %v3094_v49 = vpop.f32.mrb[7].mxu1 }
 0x2cc   : > { %v3532_v50 = vpop.f32.mrb[7].mxu0  ;;  %v4093_v51 = vadd.f32 %v4092_v44, %v3528_v43  ;;  %v4096_v52 = vadd.f32 %v3094_v49, %v5390_v22 }
 0x2cd   : > { %3559 = vst [vmem:[%s5397_s20 + $0x20] sm:$0xff] %v4091_v47  ;;  %v4095_v53 = vadd.f32 %v4094_v48, %v3530_v46 }
 0x2ce   : > { %3560 = vst [vmem:[%s5397_s20 + $0x28] sm:$0xff] %v4093_v51  ;;  %v4097_v54 = vadd.f32 %v4096_v52, %v3532_v50 }
 0x2cf   : > { %3561 = vst [vmem:[%s5397_s20 + $0x30] sm:$0xff] %v4095_v53 }
 0x2d0   : > { %3562 = vst [vmem:[%s5397_s20 + $0x38] sm:$0xff] %v4097_v54  ;;  %v3098_v55 = vpop.f32.mrb[8].mxu1 }
 0x2d1   : > { %v3536_v56 = vpop.f32.mrb[8].mxu0  ;;  %v4098_v57 = vadd.f32 %v3098_v55, %v5388_v21  ;;  %v3100_v58 = vpop.f32.mrb[9].mxu1 }
 0x2d2   : > { %v3538_v59 = vpop.f32.mrb[9].mxu0  ;;  %v4100_v60 = vadd.f32 %v3100_v58, %v5390_v22  ;;  %v3102_v61 = vpop.f32.mrb[10].mxu1 }
 0x2d3   : > { %v3540_v62 = vpop.f32.mrb[10].mxu0  ;;  %v4099_v63 = vadd.f32 %v4098_v57, %v3536_v56  ;;  %v4102_v0 = vadd.f32 %v3102_v61, %v5388_v21  ;;  %v3104_v1 = vpop.f32.mrb[11].mxu1 }
 0x2d4   : > { %v3542_v2 = vpop.f32.mrb[11].mxu0  ;;  %v4101_v3 = vadd.f32 %v4100_v60, %v3538_v59  ;;  %v4104_v4 = vadd.f32 %v3104_v1, %v5390_v22 }
 0x2d5   : > { %3563 = vst [vmem:[%s5397_s20 + $0x40] sm:$0xff] %v4099_v63  ;;  %v4103_v5 = vadd.f32 %v4102_v0, %v3540_v62 }
 0x2d6   : > { %3564 = vst [vmem:[%s5397_s20 + $0x48] sm:$0xff] %v4101_v3  ;;  %v4105_v6 = vadd.f32 %v4104_v4, %v3542_v2 }
 0x2d7   : > { %3565 = vst [vmem:[%s5397_s20 + $0x50] sm:$0xff] %v4103_v5 }
 0x2d8   : > { %3566 = vst [vmem:[%s5397_s20 + $0x58] sm:$0xff] %v4105_v6  ;;  %v3108_v7 = vpop.f32.mrb[12].mxu1 }
 0x2d9   : > { %v3546_v8 = vpop.f32.mrb[12].mxu0  ;;  %v4106_v9 = vadd.f32 %v3108_v7, %v5388_v21  ;;  %v3110_v10 = vpop.f32.mrb[13].mxu1 }
 0x2da   : > { %v3548_v11 = vpop.f32.mrb[13].mxu0  ;;  %v4108_v12 = vadd.f32 %v3110_v10, %v5390_v22  ;;  %v3112_v13 = vpop.f32.mrb[14].mxu1 }
 0x2db   : > { %v3550_v14 = vpop.f32.mrb[14].mxu0  ;;  %v4107_v15 = vadd.f32 %v4106_v9, %v3546_v8  ;;  %v4110_v16 = vadd.f32 %v3112_v13, %v5388_v21  ;;  %v3114_v17 = vpop.f32.mrb[15].mxu1 }
 0x2dc   : > { %v3552_v18 = vpop.f32.mrb[15].mxu0  ;;  %v4109_v19 = vadd.f32 %v4108_v12, %v3548_v11  ;;  %v4112_v20 = vadd.f32 %v3114_v17, %v5390_v22 }
 0x2dd   : > { %3567 = vst [vmem:[%s5397_s20 + $0x60] sm:$0xff] %v4107_v15  ;;  %v4111_v23 = vadd.f32 %v4110_v16, %v3550_v14 }
 0x2de   : > { %3568 = vst [vmem:[%s5397_s20 + $0x68] sm:$0xff] %v4109_v19  ;;  %v4113_v21 = vadd.f32 %v4112_v20, %v3552_v18 }
 0x2df   : > { %3569 = vst [vmem:[%s5397_s20 + $0x70] sm:$0xff] %v4111_v23 }
 0x2e0   : > { %3570 = vst [vmem:[%s5397_s20 + $0x78] sm:$0xff] %v4113_v21 }
 0x2e1   : > { %5025 = shalt.err (!%p5022_p7)
}
 0x2e2   : > { %s5026_s11 = scalar_lea.hbm %s5429_s23, 2048  ;;  %s5030_s22 = scalar_lea.hbm %s5480_s3, 8192 }
 0x2e3   : > { %p5027_p9 = scmp.ne.s32.totalorder %s5429_s23, %s5026_s11  ;;  %p5031_p5 = scmp.lt.u32.totalorder %s5429_s23, %s5480_s3 }
 0x2e4   : > { %p5032_p10 = scmp.lt.u32.totalorder %s5030_s22, %s5026_s11  ;;  %p5034_p1 = scmp.lt.u32.totalorder %s5026_s11, %s5429_s23 }
 0x2e5   : > { %p5028_p12 = pnand %p5027_p9, %p5226_p4 }
 0x2e6   : > { %p5033_p11 = por %p5032_p10, %p5031_p5 }
 0x2e7   : > { %p5029_p0 = pneg %p5028_p12 }
 0x2e8   : > { %p5035_p2 = por %p5034_p1, %p5033_p11 }
 0x2ea   : > { %p5036_p6 = pnand %p5035_p2, %p5029_p0 }
 0x2ec   : > { %5039 = shalt.err (!%p5036_p6)
}
 0x2ed   : > { %s5092_s18 = smov 256   ;;  %s5093_s20 = smov 16  }
 0x2ee   : > { %4287 = dma.vmem_to_hbm [thread:$0]  (%p5226_p4), %s5431_s21, 2048, %s5429_s23, %s3572_s16, %s5092_s18, %s5092_s18, %s5093_s20  }
 0x2ef PF: > { %p4309_p8 = scmp.ge.s32.totalorder %s5082_s15, 2  ;;  %s3601_s10 = sand.u32 1, %s5070_s12  }
 0x2f0   : > { %p5495_p13 = scmp.ne.s32.totalorder %s5485_s19, 0  ;;  %s3602_s26 = scalar_lea.sflag [#allocation4], %s3601_s10 }
 0x2f2   : > { %p4301_p3 = pnand %p4309_p8, %p5495_p13 }
 0x2f4   : > { %5065 = dma.done.wait (!%p4301_p3), %s3602_s26, 2048  }
 0x2f5   : > { %5067 = vsyncadd (!%p4301_p3), %s3602_s26, 4294965248  ;;  %p17_p7 = scmp.ge.s32.totalorder %s5216_s4, 6   ;;  %s5496_s12 = smov %s5074_s13 }
 0x2f6   : > { %s5497_s13 = smov %s5078_s14  ;;  %s5498_s14 = smov %s5232_s7 }
 0x2f7   : > { %s5499_s15 = smov %s5216_s4  ;;  %19 = sbr.rel (!%p17_p7) target bundleno = 6 (0x6), region = 85 }
 0x2fe   :  { %3607 = vsyncpa [#allocation3], 1 }
 0x2ff   :  { %3609 = vsyncpa [#allocation3 + $0x1], 1 }
 0x300   :  { %3610 = vsyncpa [#allocation6], 1 }
 0x301   :  { %3611 = vsyncpa [#allocation4], 1 }
 0x302   :  { %3613 = vsyncpa [#allocation4 + $0x1], 1 }

</bundles_post_ra>
